<compile_context>
chip_gen: v7x
topology: tpu7x:2x2x1
jax: 0.10.0
libtpu: 0.0.40
codegen_flags: <defaults>
</compile_context>

<pallas_src>
import functools

import jax
import jax.numpy as jnp
import numpy as np
from jax import lax
from jax.experimental import pallas as pl
from jax.experimental.pallas import tpu as pltpu


# ------------------------------ fused Pallas kernel ------------------------------


def _fused_convnet_kernel(x_ref, w1_ref, b1_ref, w2_ref, b2_ref,
                          f1w_ref, f1b_ref, f2w_ref, f2b_ref, f3w_ref, f3b_ref,
                          o_ref, *, n1p, n2p):
    """Entire ConvNet2D forward for one batch tile; all intermediates stay in VMEM/vregs."""

    def conv_relu_pool(inp_bf16, w_ref, b_ref, n_pad):
        # ONE lane-dense MXU matmul against the corner-concatenated operator (K, 4*Np),
        # then the 2x2/stride-2 max-pool as an elementwise max over the four 128-aligned
        # column slices, then a single fused bias-add + ReLU.
        # (max_c ReLU(y_c + b) == ReLU(max_c y_c + b): bias identical per corner,
        #  ReLU monotone.)
        y = jnp.dot(inp_bf16, w_ref[...], preferred_element_type=jnp.float32)
        pooled = jnp.maximum(
            jnp.maximum(y[:, 0 * n_pad:1 * n_pad], y[:, 1 * n_pad:2 * n_pad]),
            jnp.maximum(y[:, 2 * n_pad:3 * n_pad], y[:, 3 * n_pad:4 * n_pad]))
        return jnp.maximum(pooled + b_ref[...], 0.0)

    x = x_ref[...]                                                    # already bf16

    p1 = conv_relu_pool(x, w1_ref, b1_ref, n1p).astype(jnp.bfloat16)  # (BT, N1p) conv1 stage
    p2 = conv_relu_pool(p1, w2_ref, b2_ref, n2p).astype(jnp.bfloat16) # (BT, N2p) conv2 stage

    # Fused classifier: fc1 -> ReLU -> fc2 -> ReLU -> fc3, all VMEM-resident.
    h1 = jnp.maximum(
        jnp.dot(p2, f1w_ref[...], preferred_element_type=jnp.float32) + f1b_ref[...], 0.0
    ).astype(jnp.bfloat16)
    h2 = jnp.maximum(
        jnp.dot(h1, f2w_ref[...], preferred_element_type=jnp.float32) + f2b_ref[...], 0.0
    ).astype(jnp.bfloat16)
    out = jnp.dot(h2, f3w_ref[...], preferred_element_type=jnp.float32) + f3b_ref[...]
    o_ref[...] = out.astype(o_ref.dtype)                              # lane-dense (BT, 128)


# ------------------------------ host-side weight packing ------------------------------


def _conv_relu_pool_operator(w_hwio, h_in, w_in):
    """Unroll Conv2d(k, VALID, stride 1) followed by a 2x2/2 max-pool into 4 dense maps.

    Input vectors are (Cin, H, W)-flattened; output columns are (Cout, Hp, Wp)-flattened
    (exactly the next stage's / PyTorch-flatten input ordering)."""
    k, k2, cin, cout = w_hwio.shape
    assert k == k2
    ho, wo = h_in - k + 1, w_in - k + 1
    assert ho % 2 == 0 and wo % 2 == 0, "max-pool expects even conv output dims"
    hp, wp = ho // 2, wo // 2
    ops = np.zeros((4, cin * h_in * w_in, cout * hp * wp), np.float32)
    wn = np.asarray(w_hwio, np.float32)
    corners = ((0, 0), (0, 1), (1, 0), (1, 1))
    for ci in range(cin):
        for co in range(cout):
            for kh in range(k):
                for kw in range(k):
                    v = wn[kh, kw, ci, co]
                    for c, (dh, dw) in enumerate(corners):
                        for ph in range(hp):
                            base_r = ci * h_in * w_in + (2 * ph + dh + kh) * w_in
                            base_c = co * hp * wp + ph * wp
                            for pw in range(wp):
                                ops[c, base_r + 2 * pw + dw + kw, base_c + pw] = v
    return ops, hp, wp


def _rup(n, m=128):
    return ((n + m - 1) // m) * m


def _pad2(a, rows, cols):
    out = np.zeros((rows, cols), np.float32)
    out[: a.shape[0], : a.shape[1]] = a
    return out


def _pack_corner_concat(ops, k_pad, n_pad):
    """(4, K, N) corner operators -> one (k_pad, 4*n_pad) operator; corner c lives in
    columns [c*n_pad, c*n_pad + N). Padded rows/cols are exact zeros."""
    out = np.zeros((k_pad, 4 * n_pad), np.float32)
    for c in range(4):
        out[: ops.shape[1], c * n_pad: c * n_pad + ops.shape[2]] = ops[c]
    return out


def _pad_bias(v, n):
    out = np.zeros((1, n), np.float32)
    out[0, : v.shape[0]] = v
    return out


def build_fused_params(params, channels, height, width):
    """Pre-pack all weights into lane-dense (multiple-of-128) bf16/f32 kernel operands."""
    del channels  # implied by params["w1"]
    w1 = np.asarray(params["w1"], np.float32)      # (5,5,Cin,6)  HWIO
    w2 = np.asarray(params["w2"], np.float32)      # (5,5,6,16)
    b1 = np.asarray(params["b1"], np.float32)
    b2 = np.asarray(params["b2"], np.float32)

    ops1, hp1, wp1 = _conv_relu_pool_operator(w1, height, width)
    ops2, hp2, wp2 = _conv_relu_pool_operator(w2, hp1, wp1)

    k1, n1 = ops1.shape[1], ops1.shape[2]
    k2, n2 = ops2.shape[1], ops2.shape[2]
    assert k2 == n1, "conv2 input layout must match conv1 pooled output layout"

    fc1_w = np.asarray(params["fc1_w"], np.float32)    # (nf, 120)
    fc2_w = np.asarray(params["fc2_w"], np.float32)    # (120, 84)
    fc3_w = np.asarray(params["fc3_w"], np.float32)    # (84, 10)
    assert fc1_w.shape[0] == n2, "classifier input width must match pooled conv2 output"

    k1p, n1p, n2p = _rup(k1), _rup(n1), _rup(n2)
    d1p, d2p, ncp = _rup(fc1_w.shape[1]), _rup(fc2_w.shape[1]), _rup(fc3_w.shape[1])

    bf, f32 = jnp.bfloat16, jnp.float32
    return {
        "w1": jnp.asarray(_pack_corner_concat(ops1, k1p, n1p), bf),   # (K1p, 4*N1p)
        "b1": jnp.asarray(_pad_bias(np.repeat(b1, hp1 * wp1), n1p), f32),
        "w2": jnp.asarray(_pack_corner_concat(ops2, n1p, n2p), bf),   # (N1p, 4*N2p)
        "b2": jnp.asarray(_pad_bias(np.repeat(b2, hp2 * wp2), n2p), f32),
        "f1w": jnp.asarray(_pad2(fc1_w, n2p, d1p), bf),
        "f1b": jnp.asarray(_pad_bias(np.asarray(params["fc1_b"], np.float32), d1p), f32),
        "f2w": jnp.asarray(_pad2(fc2_w, d1p, d2p), bf),
        "f2b": jnp.asarray(_pad_bias(np.asarray(params["fc2_b"], np.float32), d2p), f32),
        "f3w": jnp.asarray(_pad2(fc3_w, d2p, ncp), bf),
        "f3b": jnp.asarray(_pad_bias(np.asarray(params["fc3_b"], np.float32), ncp), f32),
        "n1p": n1p,
        "n2p": n2p,
        "num_classes": int(fc3_w.shape[1]),
    }


# ------------------------------ wrapper around pallas_call ------------------------------

_WEIGHT_NAMES = ("w1", "b1", "w2", "b2", "f1w", "f1b", "f2w", "f2b", "f3w", "f3b")


def _choose_batch_tile(bp):
    # bp is a multiple of 8. Cap tiles at 256 rows (v5e single vector-store slot /
    # accumulator-spill guidance) and prefer >= 4 grid steps (>= 2 at minimum) so both
    # v7x TensorCores get work and the x-tile DMA overlaps compute.
    cands = [t for t in (256, 128, 64, 32, 16, 8) if bp % t == 0]
    for t in cands:
        if bp // t >= 4:
            return t
    for t in cands:
        if bp // t >= 2:
            return t
    return min(bp, 256)


def convnet2d_forward(x_nchw, fused):
    # layout: x_nchw is (B, C, H, W) exactly like the PyTorch module's forward input.
    b = x_nchw.shape[0]
    k1p = int(fused["w1"].shape[0])
    nout_p = int(fused["f3w"].shape[1])
    n1p, n2p = int(fused["n1p"]), int(fused["n2p"])

    # PyTorch (C,H,W)-order flatten; pad batch to a full 8-row sublane and K up to the
    # lane-dense width; cast to bf16 here so the kernel's x DMA is half the bytes.
    bp = max(8, -(-b // 8) * 8)
    x_flat = x_nchw.reshape(b, -1).astype(jnp.float32)
    x_flat = jnp.pad(x_flat, ((0, bp - b), (0, k1p - x_flat.shape[1]))).astype(jnp.bfloat16)

    bt = _choose_batch_tile(bp)
    grid = (bp // bt,)

    def full_spec(arr):
        zeros = (0,) * arr.ndim
        # Constant block index -> fetched once, resident across grid steps.
        # TODO(synk): on v7x (64 MiB VMEM) force single-buffering of these resident
        # weights (pipeline_mode=pl.Buffered(1)) if Mosaic allocates double buffers.
        return pl.BlockSpec(arr.shape, lambda i, _z=zeros: _z)

    in_specs = [pl.BlockSpec((bt, k1p), lambda i: (i, 0))]
    in_specs += [full_spec(fused[n]) for n in _WEIGHT_NAMES]

    # Advisory cost + VMEM sizing for the resident-weight design.
    weight_bytes = sum(int(fused[n].size) * fused[n].dtype.itemsize for n in _WEIGHT_NAMES)
    x_bytes = int(x_flat.size) * x_flat.dtype.itemsize
    out_bytes = bp * nout_p * 4
    d1p, d2p = int(fused["f1w"].shape[1]), int(fused["f2w"].shape[1])
    flops = 2 * bp * (k1p * 4 * n1p + n1p * 4 * n2p + n2p * d1p + d1p * d2p + d2p * nout_p)
    cost = pl.CostEstimate(flops=flops, transcendentals=0,
                           bytes_accessed=x_bytes + weight_bytes + out_bytes)

    cp_kwargs = dict(dimension_semantics=("parallel",))
    vmem_needed = 2 * weight_bytes + 4 * (bt * k1p * 2 + bt * nout_p * 4) + (2 << 20)
    if vmem_needed > (28 << 20):
        cp_kwargs["vmem_limit_bytes"] = int(min(vmem_needed, 100 << 20))

    out = pl.pallas_call(
        functools.partial(_fused_convnet_kernel, n1p=n1p, n2p=n2p),
        grid=grid,
        in_specs=in_specs,
        out_specs=pl.BlockSpec((bt, nout_p), lambda i: (i, 0)),
        out_shape=jax.ShapeDtypeStruct((bp, nout_p), jnp.float32),
        compiler_params=pltpu.CompilerParams(**cp_kwargs),
        cost_estimate=cost,
    )(x_flat, *(fused[n] for n in _WEIGHT_NAMES))
    return out[:b, : fused["num_classes"]]


# ------------------------------ params + independent reference ------------------------------


def init_params(key, channels):
    # Deterministic synthetic init; conv weights (KH, KW, Cin, Cout), linear weights (in, out).
    ks = jax.random.split(key, 10)
    scale = 0.1
    return {
        "w1": scale * jax.random.normal(ks[0], (5, 5, channels, 6), jnp.float32),
        "b1": scale * jax.random.normal(ks[1], (6,), jnp.float32),
        "w2": scale * jax.random.normal(ks[2], (5, 5, 6, 16), jnp.float32),
        "b2": scale * jax.random.normal(ks[3], (16,), jnp.float32),
        "fc1_w": scale * jax.random.normal(ks[4], (16, 120), jnp.float32),
        "fc1_b": scale * jax.random.normal(ks[5], (120,), jnp.float32),
        "fc2_w": scale * jax.random.normal(ks[6], (120, 84), jnp.float32),
        "fc2_b": scale * jax.random.normal(ks[7], (84,), jnp.float32),
        "fc3_w": scale * jax.random.normal(ks[8], (84, 10), jnp.float32),
        "fc3_b": scale * jax.random.normal(ks[9], (10,), jnp.float32),
    }


def convnet2d_reference(x_nchw, params):
    # Independent plain-JAX f32 reference (lax.conv / reduce_window) for correctness check.
    x = jnp.transpose(x_nchw, (0, 2, 3, 1))
    dn = lax.conv_dimension_numbers(x.shape, params["w1"].shape, ("NHWC", "HWIO", "NHWC"))
    y = lax.conv_general_dilated(x, params["w1"], (1, 1), "VALID", dimension_numbers=dn)
    y = jnp.maximum(y + params["b1"], 0.0)
    y = lax.reduce_window(y, -jnp.inf, lax.max, (1, 2, 2, 1), (1, 2, 2, 1), "VALID")
    dn = lax.conv_dimension_numbers(y.shape, params["w2"].shape, ("NHWC", "HWIO", "NHWC"))
    y = lax.conv_general_dilated(y, params["w2"], (1, 1), "VALID", dimension_numbers=dn)
    y = jnp.maximum(y + params["b2"], 0.0)
    y = lax.reduce_window(y, -jnp.inf, lax.max, (1, 2, 2, 1), (1, 2, 2, 1), "VALID")
    feat = jnp.transpose(y, (0, 3, 1, 2)).reshape(x.shape[0], -1)
    h = jnp.maximum(feat @ params["fc1_w"] + params["fc1_b"], 0.0)
    h = jnp.maximum(h @ params["fc2_w"] + params["fc2_b"], 0.0)
    return h @ params["fc3_w"] + params["fc3_b"]


if __name__ == "__main__":
    key = jax.random.PRNGKey(0)
    k_x, k_p = jax.random.split(key)

    # Small shapes consistent with the module: batch=2, channels=3, spatial=16x16.
    # 16 -conv5-> 12 -pool-> 6 -conv5-> 2 -pool-> 1  => num_features = 16*1*1 = 16.
    x = jax.random.normal(k_x, (2, 3, 16, 16), jnp.float32)
    params = init_params(k_p, channels=3)
    fused = build_fused_params(params, channels=3, height=16, width=16)

    out = jax.block_until_ready(convnet2d_forward(x, fused))
    assert out.shape == (2, 10), out.shape

    ref = jax.block_until_ready(convnet2d_reference(x, params))
    # bf16 MXU inputs (f32 accumulation) -> relax tolerance vs. the f32 reference.
    np.testing.assert_allclose(np.asarray(out), np.asarray(ref), rtol=2e-2, atol=2e-2)

    print("KERNEL_OK")
</pallas_src>

<mosaic_0001>
module attributes {stable_mosaic.version = 11 : i64} {
  func.func @_fused_convnet_kernel(%arg0: i32, %arg1: memref<8x768xbf16, #tpu.memory_space<vmem>>, %arg2: memref<768x1024xbf16, #tpu.memory_space<vmem>>, %arg3: memref<1x256xf32, #tpu.memory_space<vmem>>, %arg4: memref<256x512xbf16, #tpu.memory_space<vmem>>, %arg5: memref<1x128xf32, #tpu.memory_space<vmem>>, %arg6: memref<128x128xbf16, #tpu.memory_space<vmem>>, %arg7: memref<1x128xf32, #tpu.memory_space<vmem>>, %arg8: memref<128x128xbf16, #tpu.memory_space<vmem>>, %arg9: memref<1x128xf32, #tpu.memory_space<vmem>>, %arg10: memref<128x128xbf16, #tpu.memory_space<vmem>>, %arg11: memref<1x128xf32, #tpu.memory_space<vmem>>, %arg12: memref<8x128xf32, #tpu.memory_space<vmem>>) attributes {dimension_semantics = [#tpu.dimension_semantics<parallel>], iteration_bounds = array<i64: 1>, scalar_prefetch = 0 : i64, scratch_operands = 0 : i64, tpu.core_type = #tpu.core_type<tc>, window_params = [{transform_indices = @transform_0, window_bounds = array<i64: 8, 768>}, {pipeline_mode = #tpu.pipeline_mode<synchronous>, transform_indices = @transform_1, window_bounds = array<i64: 768, 1024>}, {pipeline_mode = #tpu.pipeline_mode<synchronous>, transform_indices = @transform_2, window_bounds = array<i64: 1, 256>}, {pipeline_mode = #tpu.pipeline_mode<synchronous>, transform_indices = @transform_3, window_bounds = array<i64: 256, 512>}, {pipeline_mode = #tpu.pipeline_mode<synchronous>, transform_indices = @transform_4, window_bounds = array<i64: 1, 128>}, {pipeline_mode = #tpu.pipeline_mode<synchronous>, transform_indices = @transform_5, window_bounds = array<i64: 128, 128>}, {pipeline_mode = #tpu.pipeline_mode<synchronous>, transform_indices = @transform_6, window_bounds = array<i64: 1, 128>}, {pipeline_mode = #tpu.pipeline_mode<synchronous>, transform_indices = @transform_7, window_bounds = array<i64: 128, 128>}, {pipeline_mode = #tpu.pipeline_mode<synchronous>, transform_indices = @transform_8, window_bounds = array<i64: 1, 128>}, {pipeline_mode = #tpu.pipeline_mode<synchronous>, transform_indices = @transform_9, window_bounds = array<i64: 128, 128>}, {pipeline_mode = #tpu.pipeline_mode<synchronous>, transform_indices = @transform_10, window_bounds = array<i64: 1, 128>}, {transform_indices = @transform_11, window_bounds = array<i64: 8, 128>}]} {
    %c0 = arith.constant 0 : index
    %c0_0 = arith.constant 0 : index
    %0 = vector.load %arg1[%c0, %c0_0] : memref<8x768xbf16, #tpu.memory_space<vmem>>, vector<8x768xbf16>
    %c0_1 = arith.constant 0 : index
    %c0_2 = arith.constant 0 : index
    %1 = vector.load %arg2[%c0_1, %c0_2] : memref<768x1024xbf16, #tpu.memory_space<vmem>>, vector<768x1024xbf16>
    %cst = arith.constant dense<0.000000e+00> : vector<8x1024xf32>
    %2 = tpu.matmul %0, %1, %cst {dimension_numbers = #tpu.dot_dimension_numbers<[1], [0], [0], [1], [0, 0, 1, 1], [], []>} : vector<8x768xbf16>, vector<768x1024xbf16>, vector<8x1024xf32> -> vector<8x1024xf32>
    %3 = vector.extract_strided_slice %2 {offsets = [0, 0], sizes = [8, 256], strides = [1, 1]} : vector<8x1024xf32> to vector<8x256xf32>
    %4 = vector.extract_strided_slice %2 {offsets = [0, 256], sizes = [8, 256], strides = [1, 1]} : vector<8x1024xf32> to vector<8x256xf32>
    %5 = arith.maximumf %3, %4 : vector<8x256xf32>
    %6 = vector.extract_strided_slice %2 {offsets = [0, 512], sizes = [8, 256], strides = [1, 1]} : vector<8x1024xf32> to vector<8x256xf32>
    %7 = vector.extract_strided_slice %2 {offsets = [0, 768], sizes = [8, 256], strides = [1, 1]} : vector<8x1024xf32> to vector<8x256xf32>
    %8 = arith.maximumf %6, %7 : vector<8x256xf32>
    %9 = arith.maximumf %5, %8 : vector<8x256xf32>
    %c0_3 = arith.constant 0 : index
    %c0_4 = arith.constant 0 : index
    %10 = vector.load %arg3[%c0_3, %c0_4] : memref<1x256xf32, #tpu.memory_space<vmem>>, vector<1x256xf32>
    %11 = vector.broadcast %10 : vector<1x256xf32> to vector<8x256xf32>
    %12 = arith.addf %9, %11 : vector<8x256xf32>
    %cst_5 = arith.constant 0.000000e+00 : f32
    %13 = vector.broadcast %cst_5 : f32 to vector<8x256xf32>
    %14 = arith.maximumf %12, %13 : vector<8x256xf32>
    %15 = arith.truncf %14 : vector<8x256xf32> to vector<8x256xbf16>
    %c0_6 = arith.constant 0 : index
    %c0_7 = arith.constant 0 : index
    %16 = vector.load %arg4[%c0_6, %c0_7] : memref<256x512xbf16, #tpu.memory_space<vmem>>, vector<256x512xbf16>
    %cst_8 = arith.constant dense<0.000000e+00> : vector<8x512xf32>
    %17 = tpu.matmul %15, %16, %cst_8 {dimension_numbers = #tpu.dot_dimension_numbers<[1], [0], [0], [1], [0, 0, 1, 1], [], []>} : vector<8x256xbf16>, vector<256x512xbf16>, vector<8x512xf32> -> vector<8x512xf32>
    %18 = vector.extract_strided_slice %17 {offsets = [0, 0], sizes = [8, 128], strides = [1, 1]} : vector<8x512xf32> to vector<8x128xf32>
    %19 = vector.extract_strided_slice %17 {offsets = [0, 128], sizes = [8, 128], strides = [1, 1]} : vector<8x512xf32> to vector<8x128xf32>
    %20 = arith.maximumf %18, %19 : vector<8x128xf32>
    %21 = vector.extract_strided_slice %17 {offsets = [0, 256], sizes = [8, 128], strides = [1, 1]} : vector<8x512xf32> to vector<8x128xf32>
    %22 = vector.extract_strided_slice %17 {offsets = [0, 384], sizes = [8, 128], strides = [1, 1]} : vector<8x512xf32> to vector<8x128xf32>
    %23 = arith.maximumf %21, %22 : vector<8x128xf32>
    %24 = arith.maximumf %20, %23 : vector<8x128xf32>
    %c0_9 = arith.constant 0 : index
    %c0_10 = arith.constant 0 : index
    %25 = vector.load %arg5[%c0_9, %c0_10] : memref<1x128xf32, #tpu.memory_space<vmem>>, vector<1x128xf32>
    %26 = vector.broadcast %25 : vector<1x128xf32> to vector<8x128xf32>
    %27 = arith.addf %24, %26 : vector<8x128xf32>
    %cst_11 = arith.constant 0.000000e+00 : f32
    %28 = vector.broadcast %cst_11 : f32 to vector<8x128xf32>
    %29 = arith.maximumf %27, %28 : vector<8x128xf32>
    %30 = arith.truncf %29 : vector<8x128xf32> to vector<8x128xbf16>
    %c0_12 = arith.constant 0 : index
    %c0_13 = arith.constant 0 : index
    %31 = vector.load %arg6[%c0_12, %c0_13] : memref<128x128xbf16, #tpu.memory_space<vmem>>, vector<128x128xbf16>
    %cst_14 = arith.constant dense<0.000000e+00> : vector<8x128xf32>
    %32 = tpu.matmul %30, %31, %cst_14 {dimension_numbers = #tpu.dot_dimension_numbers<[1], [0], [0], [1], [0, 0, 1, 1], [], []>} : vector<8x128xbf16>, vector<128x128xbf16>, vector<8x128xf32> -> vector<8x128xf32>
    %c0_15 = arith.constant 0 : index
    %c0_16 = arith.constant 0 : index
    %33 = vector.load %arg7[%c0_15, %c0_16] : memref<1x128xf32, #tpu.memory_space<vmem>>, vector<1x128xf32>
    %34 = vector.broadcast %33 : vector<1x128xf32> to vector<8x128xf32>
    %35 = arith.addf %32, %34 : vector<8x128xf32>
    %cst_17 = arith.constant 0.000000e+00 : f32
    %36 = vector.broadcast %cst_17 : f32 to vector<8x128xf32>
    %37 = arith.maximumf %35, %36 : vector<8x128xf32>
    %38 = arith.truncf %37 : vector<8x128xf32> to vector<8x128xbf16>
    %c0_18 = arith.constant 0 : index
    %c0_19 = arith.constant 0 : index
    %39 = vector.load %arg8[%c0_18, %c0_19] : memref<128x128xbf16, #tpu.memory_space<vmem>>, vector<128x128xbf16>
    %cst_20 = arith.constant dense<0.000000e+00> : vector<8x128xf32>
    %40 = tpu.matmul %38, %39, %cst_20 {dimension_numbers = #tpu.dot_dimension_numbers<[1], [0], [0], [1], [0, 0, 1, 1], [], []>} : vector<8x128xbf16>, vector<128x128xbf16>, vector<8x128xf32> -> vector<8x128xf32>
    %c0_21 = arith.constant 0 : index
    %c0_22 = arith.constant 0 : index
    %41 = vector.load %arg9[%c0_21, %c0_22] : memref<1x128xf32, #tpu.memory_space<vmem>>, vector<1x128xf32>
    %42 = vector.broadcast %41 : vector<1x128xf32> to vector<8x128xf32>
    %43 = arith.addf %40, %42 : vector<8x128xf32>
    %cst_23 = arith.constant 0.000000e+00 : f32
    %44 = vector.broadcast %cst_23 : f32 to vector<8x128xf32>
    %45 = arith.maximumf %43, %44 : vector<8x128xf32>
    %46 = arith.truncf %45 : vector<8x128xf32> to vector<8x128xbf16>
    %c0_24 = arith.constant 0 : index
    %c0_25 = arith.constant 0 : index
    %47 = vector.load %arg10[%c0_24, %c0_25] : memref<128x128xbf16, #tpu.memory_space<vmem>>, vector<128x128xbf16>
    %cst_26 = arith.constant dense<0.000000e+00> : vector<8x128xf32>
    %48 = tpu.matmul %46, %47, %cst_26 {dimension_numbers = #tpu.dot_dimension_numbers<[1], [0], [0], [1], [0, 0, 1, 1], [], []>} : vector<8x128xbf16>, vector<128x128xbf16>, vector<8x128xf32> -> vector<8x128xf32>
    %c0_27 = arith.constant 0 : index
    %c0_28 = arith.constant 0 : index
    %49 = vector.load %arg11[%c0_27, %c0_28] : memref<1x128xf32, #tpu.memory_space<vmem>>, vector<1x128xf32>
    %50 = vector.broadcast %49 : vector<1x128xf32> to vector<8x128xf32>
    %51 = arith.addf %48, %50 : vector<8x128xf32>
    %c0_29 = arith.constant 0 : index
    %c0_30 = arith.constant 0 : index
    %52 = vector.load %arg12[%c0_29, %c0_30] : memref<8x128xf32, #tpu.memory_space<vmem>>, vector<8x128xf32>
    tpu.vector_store %arg12[%c0_29, %c0_30], %51 {strides = array<i32>} : memref<8x128xf32, #tpu.memory_space<vmem>>, vector<8x128xf32>,
    return
  }
  func.func @transform_0(%arg0: i32) -> (i32, i32) {
    %c0_i32 = arith.constant 0 : i32
    %c0_i32_0 = arith.constant 0 : i32
    return %arg0, %c0_i32 : i32, i32
  }
  func.func @transform_1(%arg0: i32) -> (i32, i32) {
    %c0_i32 = arith.constant 0 : i32
    %c0_i32_0 = arith.constant 0 : i32
    %c0_i32_1 = arith.constant 0 : i32
    return %c0_i32, %c0_i32_0 : i32, i32
  }
  func.func @transform_2(%arg0: i32) -> (i32, i32) {
    %c0_i32 = arith.constant 0 : i32
    %c0_i32_0 = arith.constant 0 : i32
    %c0_i32_1 = arith.constant 0 : i32
    return %c0_i32, %c0_i32_0 : i32, i32
  }
  func.func @transform_3(%arg0: i32) -> (i32, i32) {
    %c0_i32 = arith.constant 0 : i32
    %c0_i32_0 = arith.constant 0 : i32
    %c0_i32_1 = arith.constant 0 : i32
    return %c0_i32, %c0_i32_0 : i32, i32
  }
  func.func @transform_4(%arg0: i32) -> (i32, i32) {
    %c0_i32 = arith.constant 0 : i32
    %c0_i32_0 = arith.constant 0 : i32
    %c0_i32_1 = arith.constant 0 : i32
    return %c0_i32, %c0_i32_0 : i32, i32
  }
  func.func @transform_5(%arg0: i32) -> (i32, i32) {
    %c0_i32 = arith.constant 0 : i32
    %c0_i32_0 = arith.constant 0 : i32
    %c0_i32_1 = arith.constant 0 : i32
    return %c0_i32, %c0_i32_0 : i32, i32
  }
  func.func @transform_6(%arg0: i32) -> (i32, i32) {
    %c0_i32 = arith.constant 0 : i32
    %c0_i32_0 = arith.constant 0 : i32
    %c0_i32_1 = arith.constant 0 : i32
    return %c0_i32, %c0_i32_0 : i32, i32
  }
  func.func @transform_7(%arg0: i32) -> (i32, i32) {
    %c0_i32 = arith.constant 0 : i32
    %c0_i32_0 = arith.constant 0 : i32
    %c0_i32_1 = arith.constant 0 : i32
    return %c0_i32, %c0_i32_0 : i32, i32
  }
  func.func @transform_8(%arg0: i32) -> (i32, i32) {
    %c0_i32 = arith.constant 0 : i32
    %c0_i32_0 = arith.constant 0 : i32
    %c0_i32_1 = arith.constant 0 : i32
    return %c0_i32, %c0_i32_0 : i32, i32
  }
  func.func @transform_9(%arg0: i32) -> (i32, i32) {
    %c0_i32 = arith.constant 0 : i32
    %c0_i32_0 = arith.constant 0 : i32
    %c0_i32_1 = arith.constant 0 : i32
    return %c0_i32, %c0_i32_0 : i32, i32
  }
  func.func @transform_10(%arg0: i32) -> (i32, i32) {
    %c0_i32 = arith.constant 0 : i32
    %c0_i32_0 = arith.constant 0 : i32
    %c0_i32_1 = arith.constant 0 : i32
    return %c0_i32, %c0_i32_0 : i32, i32
  }
  func.func @transform_11(%arg0: i32) -> (i32, i32) {
    %c0_i32 = arith.constant 0 : i32
    %c0_i32_0 = arith.constant 0 : i32
    return %arg0, %c0_i32 : i32, i32
  }
}

</mosaic_0001>

<bundles_post_ra>
// kernel: tpu_custom_call.1
= control target key start
LH: loop header
LB: loop body
LE: loop exit
PB: predicated region body
PF: predicated region fallthrough
CT: control target
= control target key end

     0   :  { %16 = vsyncpa [#allocation3], 0  ;;  %s5218_s0 = inlined_call_operand.hbm [shape: bf16[8,768], index: 0, kind: input, shape index: {}]   ;;  %s5219_s1 = inlined_call_operand.hbm [shape: bf16[768,1024], index: 1, kind: input, shape index: {}]   ;;  %s5220_s2 = inlined_call_operand.hbm [shape: f32[1,256], index: 2, kind: input, shape index: {}]   ;;  %s5221_s3 = inlined_call_operand.hbm [shape: bf16[256,512], index: 3, kind: input, shape index: {}]   ;;  %s5222_s4 = inlined_call_operand.hbm [shape: f32[1,128], index: 4, kind: input, shape index: {}]   ;;  %s5223_s5 = inlined_call_operand.hbm [shape: bf16[128,128], index: 5, kind: input, shape index: {}]   ;;  %s5224_s6 = inlined_call_operand.hbm [shape: f32[1,128], index: 6, kind: input, shape index: {}]   ;;  %s5225_s7 = inlined_call_operand.hbm [shape: bf16[128,128], index: 7, kind: input, shape index: {}]   ;;  %s5226_s8 = inlined_call_operand.hbm [shape: f32[1,128], index: 8, kind: input, shape index: {}]   ;;  %s5227_s9 = inlined_call_operand.hbm [shape: bf16[128,128], index: 9, kind: input, shape index: {}]   ;;  %s5228_s10 = inlined_call_operand.hbm [shape: f32[1,128], index: 10, kind: input, shape index: {}]   ;;  %s5229_s11 = inlined_call_operand.hbm [shape: f32[8,128], index: 11, kind: output, shape index: {}]  }
   0x1   :  { %17 = vsyncpa [#allocation6], 0 }
   0x2   :  { %18 = vsyncpa [#allocation9], 0 }
   0x3   :  { %19 = vsyncpa [#allocation12], 0 }
   0x4   :  { %20 = vsyncpa [#allocation15], 0 }
   0x5   :  { %21 = vsyncpa [#allocation18], 0 }
   0x6   :  { %22 = vsyncpa [#allocation4], 0  ;;  %s4883_s17 = smov [#allocation5]   ;;  %s4605_s21 = scalar_lea.hbm %s5219_s1, 49152 }
   0x7   :  { %s38_s18 = sshll.u32 %s4883_s17, 4  ;;  %p4606_p0 = scmp.ne.s32.totalorder %s5219_s1, %s4605_s21  ;;  %s39_s18 = int_to_ptr.vmem [resolvable:$true] %s38_s18 }
   0x8   :  { %p4609_p1 = scmp.lt.u32.totalorder %s4605_s21, %s5219_s1 }
   0xa   :  { %p4611_p2 = pnand %p4609_p1, %p4606_p0 }
   0xc   :  { %4614 = shalt.err (!%p4611_p2)
}
   0xd   :  { %s4615_s26 = scalar_lea.vmem %s39_s18, 49152  ;;  %p4620_p4 = scmp.lt.s32.totalorder %s39_s18, %s39_s18 }
   0xe   :  { %p4616_p3 = scmp.ne.s32.totalorder %s39_s18, %s4615_s26  ;;  %p4621_p5 = scmp.lt.s32.totalorder %s4615_s26, %s4615_s26 }
  0x10   :  { %p4622_p6 = por %p4621_p5, %p4620_p4 }
  0x12   :  { %p4623_p7 = pnand %p4622_p6, %p4616_p3 }
  0x14   :  { %4626 = shalt.err (!%p4623_p7)
}
  0x15   :  { %s4884_s27 = smov 512   ;;  %s4885_s28 = smov 32  }
  0x16   :  { %44 = dma.hbm_to_vmem [thread:$0]  %s5219_s1, 49152, %s39_s18, [#allocation6], %s4884_s27, %s4884_s27, %s4885_s28  }
  0x17   :  { %s4886_s12 = smov [#allocation8]   ;;  %s4627_s16 = scalar_lea.hbm %s5221_s3, 8192 }
  0x18   :  { %s60_s13 = sshll.u32 %s4886_s12, 4  ;;  %p4628_p8 = scmp.ne.s32.totalorder %s5221_s3, %s4627_s16  ;;  %s61_s13 = int_to_ptr.vmem [resolvable:$true] %s60_s13 }
  0x19   :  { %p4631_p9 = scmp.lt.u32.totalorder %s4627_s16, %s5221_s3 }
  0x1b   :  { %p4633_p10 = pnand %p4631_p9, %p4628_p8 }
  0x1d   :  { %4636 = shalt.err (!%p4633_p10)
}
  0x1e   :  { %s4637_s22 = scalar_lea.vmem %s61_s13, 8192  ;;  %p4642_p12 = scmp.lt.s32.totalorder %s61_s13, %s61_s13 }
  0x1f   :  { %p4638_p11 = scmp.ne.s32.totalorder %s61_s13, %s4637_s22  ;;  %p4643_p13 = scmp.lt.s32.totalorder %s4637_s22, %s4637_s22 }
  0x21   :  { %p4644_p0 = por %p4643_p13, %p4642_p12 }
  0x23   :  { %p4645_p1 = pnand %p4644_p0, %p4638_p11 }
  0x25   :  { %4648 = shalt.err (!%p4645_p1)
}
  0x26   :  { %s4887_s1 = smov 256   ;;  %s4888_s18 = smov 16  }
  0x27   :  { %66 = dma.hbm_to_vmem [thread:$0]  %s5221_s3, 8192, %s61_s13, [#allocation9], %s4887_s1, %s4887_s1, %s4888_s18  }
  0x28   :  { %s4889_s25 = smov [#allocation11]   ;;  %s4649_s29 = scalar_lea.hbm %s5223_s5, 1024 }
  0x29   :  { %s82_s26 = sshll.u32 %s4889_s25, 4  ;;  %p4650_p2 = scmp.ne.s32.totalorder %s5223_s5, %s4649_s29  ;;  %s83_s26 = int_to_ptr.vmem [resolvable:$true] %s82_s26 }
  0x2a   :  { %p4653_p3 = scmp.lt.u32.totalorder %s4649_s29, %s5223_s5 }
  0x2c   :  { %p4655_p4 = pnand %p4653_p3, %p4650_p2 }
  0x2e   :  { %4658 = shalt.err (!%p4655_p4)
}
  0x2f   :  { %s4659_s16 = scalar_lea.vmem %s83_s26, 1024  ;;  %p4664_p6 = scmp.lt.s32.totalorder %s83_s26, %s83_s26 }
  0x30   :  { %p4660_p5 = scmp.ne.s32.totalorder %s83_s26, %s4659_s16  ;;  %p4665_p7 = scmp.lt.s32.totalorder %s4659_s16, %s4659_s16 }
  0x32   :  { %p4666_p8 = por %p4665_p7, %p4664_p6 }
  0x34   :  { %p4667_p9 = pnand %p4666_p8, %p4660_p5 }
  0x36   :  { %4670 = shalt.err (!%p4667_p9)
}
  0x37   :  { %s4890_s3 = smov 64   ;;  %s4891_s13 = smov 4  }
  0x38   :  { %88 = dma.hbm_to_vmem [thread:$0]  %s5223_s5, 1024, %s83_s26, [#allocation12], %s4890_s3, %s4890_s3, %s4891_s13  }
  0x39   :  { %s4892_s20 = smov [#allocation14]   ;;  %s4893_s22 = smov [#allocation17]  }
  0x3a   :  { %s104_s21 = sshll.u32 %s4892_s20, 4  ;;  %s126_s1 = sshll.u32 %s4893_s22, 4  ;;  %s105_s21 = int_to_ptr.vmem [resolvable:$true] %s104_s21  ;;  %s127_s1 = int_to_ptr.vmem [resolvable:$true] %s126_s1 }
  0x3b   :  { %s4671_s24 = scalar_lea.hbm %s5225_s7, 1024 }
  0x3c   :  { %p4672_p10 = scmp.ne.s32.totalorder %s5225_s7, %s4671_s24  ;;  %p4675_p11 = scmp.lt.u32.totalorder %s4671_s24, %s5225_s7 }
  0x3e   :  { %p4677_p12 = pnand %p4675_p11, %p4672_p10 }
  0x40   :  { %4680 = shalt.err (!%p4677_p12)
}
  0x41   :  { %s4681_s5 = scalar_lea.vmem %s105_s21, 1024  ;;  %p4686_p0 = scmp.lt.s32.totalorder %s105_s21, %s105_s21 }
  0x42   :  { %p4682_p13 = scmp.ne.s32.totalorder %s105_s21, %s4681_s5  ;;  %p4687_p1 = scmp.lt.s32.totalorder %s4681_s5, %s4681_s5 }
  0x44   :  { %p4688_p2 = por %p4687_p1, %p4686_p0 }
  0x46   :  { %p4689_p3 = pnand %p4688_p2, %p4682_p13 }
  0x48   :  { %4692 = shalt.err (!%p4689_p3)
}
  0x49   :  { %110 = dma.hbm_to_vmem [thread:$0]  %s5225_s7, 1024, %s105_s21, [#allocation15], %s4890_s3, %s4890_s3, %s4891_s13  }
  0x4a   :  { %s4693_s15 = scalar_lea.hbm %s5227_s9, 1024 }
  0x4b   :  { %p4694_p4 = scmp.ne.s32.totalorder %s5227_s9, %s4693_s15  ;;  %p4697_p5 = scmp.lt.u32.totalorder %s4693_s15, %s5227_s9 }
  0x4d   :  { %p4699_p6 = pnand %p4697_p5, %p4694_p4 }
  0x4f   :  { %4702 = shalt.err (!%p4699_p6)
}
  0x50   :  { %s4703_s22 = scalar_lea.vmem %s127_s1, 1024  ;;  %p4708_p8 = scmp.lt.s32.totalorder %s127_s1, %s127_s1 }
  0x51   :  { %p4704_p7 = scmp.ne.s32.totalorder %s127_s1, %s4703_s22  ;;  %p4709_p9 = scmp.lt.s32.totalorder %s4703_s22, %s4703_s22 }
  0x53   :  { %p4710_p10 = por %p4709_p9, %p4708_p8 }
  0x55   :  { %p4711_p11 = pnand %p4710_p10, %p4704_p7 }
  0x57   :  { %4714 = shalt.err (!%p4711_p11)
}
  0x58   :  { %132 = dma.hbm_to_vmem [thread:$0]  %s5227_s9, 1024, %s127_s1, [#allocation18], %s4890_s3, %s4890_s3, %s4891_s13  }
  0x59   :  { %s4894_s18 = smov [#allocation2]   ;;  %s4895_s24 = smov [#allocation7]  }
  0x5a   :  { %s29_s23 = sshll.u32 %s4894_s18, 4  ;;  %s51_s25 = sshll.u32 %s4895_s24, 4  ;;  %s30_s23 = int_to_ptr.vmem [resolvable:$true] %s29_s23  ;;  %s52_s25 = int_to_ptr.vmem [resolvable:$true] %s51_s25 }
  0x5b   :  { %s4715_s29 = scalar_lea.hbm %s5218_s0, 384 }
  0x5c   :  { %p4716_p12 = scmp.ne.s32.totalorder %s5218_s0, %s4715_s29  ;;  %p4719_p13 = scmp.lt.u32.totalorder %s4715_s29, %s5218_s0 }
  0x5e   :  { %p4721_p0 = pnand %p4719_p13, %p4716_p12 }
  0x60   :  { %4724 = shalt.err (!%p4721_p0)
}
  0x61   :  { %s4725_s9 = scalar_lea.vmem %s30_s23, 384  ;;  %p4730_p2 = scmp.lt.s32.totalorder %s30_s23, %s30_s23 }
  0x62   :  { %p4726_p1 = scmp.ne.s32.totalorder %s30_s23, %s4725_s9  ;;  %p4731_p3 = scmp.lt.s32.totalorder %s4725_s9, %s4725_s9 }
  0x64   :  { %p4732_p4 = por %p4731_p3, %p4730_p2 }
  0x66   :  { %p4733_p5 = pnand %p4732_p4, %p4726_p1 }
  0x68   :  { %4736 = shalt.err (!%p4733_p5)
}
  0x69   :  { %32 = dma.hbm_to_vmem [thread:$0]  %s5218_s0, 384, %s30_s23, [#allocation3]  }
  0x6a   :  { %s4737_s15 = scalar_lea.hbm %s5220_s2, 32 }
  0x6b   :  { %p4738_p6 = scmp.ne.s32.totalorder %s5220_s2, %s4737_s15  ;;  %p4741_p7 = scmp.lt.u32.totalorder %s4737_s15, %s5220_s2 }
  0x6d   :  { %p4743_p8 = pnand %p4741_p7, %p4738_p6 }
  0x6f   :  { %4746 = shalt.err (!%p4743_p8)
}
  0x70   :  { %s4747_s22 = scalar_lea.vmem %s52_s25, 32  ;;  %p4752_p10 = scmp.lt.s32.totalorder %s52_s25, %s52_s25 }
  0x71   :  { %p4748_p9 = scmp.ne.s32.totalorder %s52_s25, %s4747_s22  ;;  %p4753_p11 = scmp.lt.s32.totalorder %s4747_s22, %s4747_s22 }
  0x73   :  { %p4754_p12 = por %p4753_p11, %p4752_p10 }
  0x75   :  { %p4755_p13 = pnand %p4754_p12, %p4748_p9 }
  0x77   :  { %4758 = shalt.err (!%p4755_p13)
}
  0x78   :  { %54 = dma.hbm_to_vmem [thread:$0]  %s5220_s2, 32, %s52_s25, [#allocation6]  }
  0x79   :  { %s4896_s21 = smov [#allocation10]   ;;  %s4897_s23 = smov [#allocation13]  }
  0x7a   :  { %s73_s18 = sshll.u32 %s4896_s21, 4  ;;  %s95_s24 = sshll.u32 %s4897_s23, 4  ;;  %s74_s18 = int_to_ptr.vmem [resolvable:$true] %s73_s18  ;;  %s96_s24 = int_to_ptr.vmem [resolvable:$true] %s95_s24 }
  0x7b   :  { %s4759_s29 = scalar_lea.hbm %s5222_s4, 16 }
  0x7c   :  { %p4760_p0 = scmp.ne.s32.totalorder %s5222_s4, %s4759_s29  ;;  %p4763_p1 = scmp.lt.u32.totalorder %s4759_s29, %s5222_s4 }
  0x7e   :  { %p4765_p2 = pnand %p4763_p1, %p4760_p0 }
  0x80   :  { %4768 = shalt.err (!%p4765_p2)
}
  0x81   :  { %s4769_s2 = scalar_lea.vmem %s74_s18, 16  ;;  %s4773_s25 = scalar_lea.vmem %s74_s18, 32 }
  0x82   :  { %p4770_p3 = scmp.ne.s32.totalorder %s74_s18, %s4769_s2  ;;  %p4774_p4 = scmp.lt.s32.totalorder %s74_s18, %s74_s18 }
  0x83   :  { %p4775_p5 = scmp.lt.s32.totalorder %s4773_s25, %s4769_s2 }
  0x85   :  { %p4776_p6 = por %p4775_p5, %p4774_p4 }
  0x87   :  { %p4777_p7 = pnand %p4776_p6, %p4770_p3 }
  0x89   :  { %4780 = shalt.err (!%p4777_p7)
}
  0x8a   :  { %76 = dma.hbm_to_vmem [thread:$0]  %s5222_s4, 16, %s74_s18, [#allocation9]  }
  0x8b   :  { %s4781_s14 = scalar_lea.hbm %s5224_s6, 16 }
  0x8c   :  { %p4782_p8 = scmp.ne.s32.totalorder %s5224_s6, %s4781_s14  ;;  %p4785_p9 = scmp.lt.u32.totalorder %s4781_s14, %s5224_s6 }
  0x8e   :  { %p4787_p10 = pnand %p4785_p9, %p4782_p8 }
  0x90   :  { %4790 = shalt.err (!%p4787_p10)
}
  0x91   :  { %s4791_s20 = scalar_lea.vmem %s96_s24, 16  ;;  %s4795_s22 = scalar_lea.vmem %s96_s24, 32 }
  0x92   :  { %p4792_p11 = scmp.ne.s32.totalorder %s96_s24, %s4791_s20  ;;  %p4796_p12 = scmp.lt.s32.totalorder %s96_s24, %s96_s24 }
  0x93   :  { %p4797_p13 = scmp.lt.s32.totalorder %s4795_s22, %s4791_s20 }
  0x95   :  { %p4798_p0 = por %p4797_p13, %p4796_p12 }
  0x97   :  { %p4799_p1 = pnand %p4798_p0, %p4792_p11 }
  0x99   :  { %4802 = shalt.err (!%p4799_p1)
}
  0x9a   :  { %98 = dma.hbm_to_vmem [thread:$0]  %s5224_s6, 16, %s96_s24, [#allocation12]  }
  0x9b   :  { %s4898_s7 = smov [#allocation16]   ;;  %s4899_s18 = smov [#allocation19]  }
  0x9c   :  { %s117_s21 = sshll.u32 %s4898_s7, 4  ;;  %s139_s23 = sshll.u32 %s4899_s18, 4  ;;  %s118_s21 = int_to_ptr.vmem [resolvable:$true] %s117_s21  ;;  %s140_s23 = int_to_ptr.vmem [resolvable:$true] %s139_s23 }
  0x9d   :  { %s4803_s29 = scalar_lea.hbm %s5226_s8, 16 }
  0x9e   :  { %p4804_p2 = scmp.ne.s32.totalorder %s5226_s8, %s4803_s29  ;;  %p4807_p3 = scmp.lt.u32.totalorder %s4803_s29, %s5226_s8 }
  0xa0   :  { %p4809_p4 = pnand %p4807_p3, %p4804_p2 }
  0xa2   :  { %4812 = shalt.err (!%p4809_p4)
}
  0xa3   :  { %s4813_s6 = scalar_lea.vmem %s118_s21, 16  ;;  %s4817_s24 = scalar_lea.vmem %s118_s21, 32 }
  0xa4   :  { %p4814_p5 = scmp.ne.s32.totalorder %s118_s21, %s4813_s6  ;;  %p4818_p6 = scmp.lt.s32.totalorder %s118_s21, %s118_s21 }
  0xa5   :  { %p4819_p7 = scmp.lt.s32.totalorder %s4817_s24, %s4813_s6 }
  0xa7   :  { %p4820_p8 = por %p4819_p7, %p4818_p6 }
  0xa9   :  { %p4821_p9 = pnand %p4820_p8, %p4814_p5 }
  0xab   :  { %4824 = shalt.err (!%p4821_p9)
}
  0xac   :  { %120 = dma.hbm_to_vmem [thread:$0]  %s5226_s8, 16, %s118_s21, [#allocation15]  }
  0xad   :  { %s4825_s13 = scalar_lea.hbm %s5228_s10, 16 }
  0xae   :  { %p4826_p10 = scmp.ne.s32.totalorder %s5228_s10, %s4825_s13  ;;  %p4829_p11 = scmp.lt.u32.totalorder %s4825_s13, %s5228_s10 }
  0xb0   :  { %p4831_p12 = pnand %p4829_p11, %p4826_p10 }
  0xb2   :  { %4834 = shalt.err (!%p4831_p12)
}
  0xb3   :  { %s4835_s17 = scalar_lea.vmem %s140_s23, 16  ;;  %s4839_s19 = scalar_lea.vmem %s140_s23, 32 }
  0xb4   :  { %p4836_p13 = scmp.ne.s32.totalorder %s140_s23, %s4835_s17  ;;  %p4840_p0 = scmp.lt.s32.totalorder %s140_s23, %s140_s23 }
  0xb5   :  { %p4841_p1 = scmp.lt.s32.totalorder %s4839_s19, %s4835_s17 }
  0xb7   :  { %p4842_p2 = por %p4841_p1, %p4840_p0 }
  0xb9   :  { %p4843_p3 = pnand %p4842_p2, %p4836_p13 }
  0xbb   :  { %4846 = shalt.err (!%p4843_p3)
}
  0xbc   :  { %142 = dma.hbm_to_vmem [thread:$0]  %s5228_s10, 16, %s140_s23, [#allocation18]  }
  0xbd   :  { %4869 = dma.done.wait [#allocation3], 384  }
  0xbe   :  { %4870 = vsyncadd [#allocation3], 4294966912 }
  0xbf   :  { %4871 = dma.done.wait [#allocation6], 49184  }
  0xc0   :  { %4872 = vsyncadd [#allocation6], 4294918112 }
  0xc1   :  { %4873 = dma.done.wait [#allocation9], 8208  }
  0xc2   :  { %4874 = vsyncadd [#allocation9], 4294959088 }
  0xc3   :  { %4875 = dma.done.wait [#allocation12], 1040  }
  0xc4   :  { %4876 = vsyncadd [#allocation12], 4294966256 }
  0xc5   :  { %4877 = dma.done.wait [#allocation15], 1040  }
  0xc6   :  { %4878 = vsyncadd [#allocation15], 4294966256 }
  0xc7   :  { %4879 = dma.done.wait [#allocation18], 1040  }
  0xc8   :  { %4880 = vsyncadd [#allocation18], 4294966256  ;;  %v180_v0 = vld [vmem:[#allocation5] sm:$0xff]  ;;  %v181_v2 = vld [vmem:[#allocation5 + $0x8] sm:$0xff]  ;;  %vm4901_vm0 = vmmov 0   ;;  %s4902_s10 = smov [#allocation20]  }
  0xc9   :  { %v184_v1 = vld [vmem:[#allocation5 + $0x20] sm:$0xff]  ;;  %v185_v4 = vld [vmem:[#allocation5 + $0x28] sm:$0xff]  ;;  %s3844_s22 = sshll.u32 %s4902_s10, 4  ;;  %s3845_s22 = int_to_ptr.vmem [resolvable:$true] %s3844_s22 }
  0xca   :  { %v3865_v3 = vcombine.high %v180_v0, %v184_v1  ;;  %v3864_v5 = vcombine.low %v180_v0, %v184_v1  ;;  %v188_v6 = vld [vmem:[#allocation5 + $0x40] sm:$0xff]  ;;  %v3867_v8 = vcombine.high %v181_v2, %v185_v4  ;;  %v3866_v9 = vcombine.low %v181_v2, %v185_v4  ;;  %v189_v11 = vld [vmem:[#allocation5 + $0x48] sm:$0xff]  ;;  %s4847_s4 = scalar_lea.vmem %s3845_s22, 128  ;;  %p4852_p5 = scmp.lt.s32.totalorder %s3845_s22, %s3845_s22 }
  0xcb   :  { %v192_v7 = vld [vmem:[#allocation5 + $0x60] sm:$0xff]  ;;  %v193_v12 = vld [vmem:[#allocation5 + $0x68] sm:$0xff]  ;;  %p4848_p4 = scmp.ne.s32.totalorder %s3845_s22, %s4847_s4  ;;  %p4853_p6 = scmp.lt.s32.totalorder %s4847_s4, %s4847_s4 }
  0xcc   :  { %v3873_v10 = vcombine.high %v188_v6, %v192_v7  ;;  %v196_v13 = vld [vmem:[#allocation5 + $0x80] sm:$0xff]  ;;  %2505 = vmatprep.subr.bf16.mxu0 %v3865_v3  ;;  %v3875_v14 = vcombine.high %v189_v11, %v193_v12  ;;  %v197_v16 = vld [vmem:[#allocation5 + $0x88] sm:$0xff]  ;;  %2628 = vmatprep.subr.bf16.mxu1 %v3867_v8  ;;  %v3872_v18 = vcombine.low %v188_v6, %v192_v7 }
  0xcd   :  { %v200_v15 = vld [vmem:[#allocation5 + $0xa0] sm:$0xff]  ;;  %v201_v17 = vld [vmem:[#allocation5 + $0xa8] sm:$0xff]  ;;  %2506 = vmatpush1.bf16.msra.mxu0 %v3864_v5  ;;  %2629 = vmatpush1.bf16.msra.mxu1 %v3866_v9  ;;  %v3874_v19 = vcombine.low %v189_v11, %v193_v12  ;;  %p4854_p7 = por %p4853_p6, %p4852_p5 }
  0xce   :  { %2507 = vmatprep.subr.bf16.mxu0 %v3873_v10  ;;  %v3881_v20 = vcombine.high %v196_v13, %v200_v15  ;;  %2630 = vmatprep.subr.bf16.mxu1 %v3875_v14  ;;  %v3883_v21 = vcombine.high %v197_v16, %v201_v17  ;;  %v204_v22 = vld [vmem:[#allocation5 + $0xc0] sm:$0xff]  ;;  %v205_v24 = vld [vmem:[#allocation5 + $0xc8] sm:$0xff]  ;;  %v3880_v26 = vcombine.low %v196_v13, %v200_v15 }
  0xcf   :  { %v208_v23 = vld [vmem:[#allocation5 + $0xe0] sm:$0xff]  ;;  %v209_v25 = vld [vmem:[#allocation5 + $0xe8] sm:$0xff]  ;;  %v3882_v27 = vcombine.low %v197_v16, %v201_v17  ;;  %p4855_p8 = pnand %p4854_p7, %p4848_p4 }
  0xd0   :  { %v3889_v28 = vcombine.high %v204_v22, %v208_v23  ;;  %v3891_v29 = vcombine.high %v205_v24, %v209_v25  ;;  %v212_v30 = vld [vmem:[#allocation5 + $0x100] sm:$0xff]  ;;  %v213_v32 = vld [vmem:[#allocation5 + $0x108] sm:$0xff]  ;;  %v3888_v34 = vcombine.low %v204_v22, %v208_v23  ;;  %v3890_v35 = vcombine.low %v205_v24, %v209_v25 }
  0xd1   :  { %2508 = vmatpush1.bf16.msra.mxu0 %v3872_v18  ;;  %2631 = vmatpush1.bf16.msra.mxu1 %v3874_v19  ;;  %v216_v31 = vld [vmem:[#allocation5 + $0x120] sm:$0xff]  ;;  %v217_v33 = vld [vmem:[#allocation5 + $0x128] sm:$0xff] }
  0xd2   :  { %2509 = vmatprep.subr.bf16.mxu0 %v3881_v20  ;;  %2632 = vmatprep.subr.bf16.mxu1 %v3883_v21  ;;  %v3897_v36 = vcombine.high %v212_v30, %v216_v31  ;;  %v3899_v37 = vcombine.high %v213_v32, %v217_v33  ;;  %v220_v38 = vld [vmem:[#allocation5 + $0x140] sm:$0xff]  ;;  %v221_v40 = vld [vmem:[#allocation5 + $0x148] sm:$0xff]  ;;  %v3896_v42 = vcombine.low %v212_v30, %v216_v31 }
  0xd3   :  { %v224_v39 = vld [vmem:[#allocation5 + $0x160] sm:$0xff]  ;;  %v225_v41 = vld [vmem:[#allocation5 + $0x168] sm:$0xff]  ;;  %v3898_v43 = vcombine.low %v213_v32, %v217_v33 }
  0xd4   :  { %v3905_v44 = vcombine.high %v220_v38, %v224_v39  ;;  %v3907_v45 = vcombine.high %v221_v40, %v225_v41  ;;  %v228_v46 = vld [vmem:[#allocation5 + $0x180] sm:$0xff]  ;;  %v229_v48 = vld [vmem:[#allocation5 + $0x188] sm:$0xff]  ;;  %v3904_v50 = vcombine.low %v220_v38, %v224_v39  ;;  %v3906_v51 = vcombine.low %v221_v40, %v225_v41 }
  0xd5   :  { %2510 = vmatpush1.bf16.msra.mxu0 %v3880_v26  ;;  %2633 = vmatpush1.bf16.msra.mxu1 %v3882_v27  ;;  %v232_v47 = vld [vmem:[#allocation5 + $0x1a0] sm:$0xff]  ;;  %v233_v49 = vld [vmem:[#allocation5 + $0x1a8] sm:$0xff] }
  0xd6   :  { %2511 = vmatprep.subr.bf16.mxu0 %v3889_v28  ;;  %2634 = vmatprep.subr.bf16.mxu1 %v3891_v29  ;;  %v3913_v52 = vcombine.high %v228_v46, %v232_v47  ;;  %v5104_v53 = vld [vmem:[#allocation2] sm:$0xff]  ;;  %v3915_v54 = vcombine.high %v229_v48, %v233_v49  ;;  %v236_v55 = vld [vmem:[#allocation5 + $0x1c0] sm:$0xff]  ;;  %v3912_v60 = vcombine.low %v228_v46, %v232_v47 }
  0xd7   :  { %v240_v56 = vld [vmem:[#allocation5 + $0x1e0] sm:$0xff]  ;;  %v5108_v57 = vcombine.high %v5104_v53, %v5104_v53  ;;  %v237_v58 = vld [vmem:[#allocation5 + $0x1c8] sm:$0xff]  ;;  %v3914_v61 = vcombine.low %v229_v48, %v233_v49 }
  0xd8   :  { %v241_v59 = vld [vmem:[#allocation5 + $0x1e8] sm:$0xff]  ;;  %v3921_v62 = vcombine.high %v236_v55, %v240_v56  ;;  %v244_v0 = vld [vmem:[#allocation5 + $0x200] sm:$0xff]  ;;  %v3920_v4 = vcombine.low %v236_v55, %v240_v56 }
  0xd9   :  { %2512 = vmatpush1.bf16.msra.mxu0 %v3888_v34  ;;  %2635 = vmatpush1.bf16.msra.mxu1 %v3890_v35  ;;  %v3923_v63 = vcombine.high %v237_v58, %v241_v59  ;;  %v248_v1 = vld [vmem:[#allocation5 + $0x220] sm:$0xff]  ;;  %v245_v2 = vld [vmem:[#allocation5 + $0x208] sm:$0xff]  ;;  %v3922_v5 = vcombine.low %v237_v58, %v241_v59 }
  0xda   :  { %2513 = vmatprep.subr.bf16.mxu0 %v3897_v36  ;;  %2636 = vmatprep.subr.bf16.mxu1 %v3899_v37  ;;  %v249_v3 = vld [vmem:[#allocation5 + $0x228] sm:$0xff]  ;;  %v3929_v6 = vcombine.high %v244_v0, %v248_v1  ;;  %v252_v8 = vld [vmem:[#allocation5 + $0x240] sm:$0xff]  ;;  %v3928_v12 = vcombine.low %v244_v0, %v248_v1 }
  0xdb   :  { %2537 = vmatprep.mubr.bf16.mxu0 %v5108_v57  ;;  %2660 = vmatprep.mubr.bf16.mxu1 %v5108_v57  ;;  %v3931_v7 = vcombine.high %v245_v2, %v249_v3  ;;  %v256_v9 = vld [vmem:[#allocation5 + $0x260] sm:$0xff]  ;;  %v253_v10 = vld [vmem:[#allocation5 + $0x248] sm:$0xff]  ;;  %v3930_v13 = vcombine.low %v245_v2, %v249_v3 }
  0xdc   :  { %v257_v11 = vld [vmem:[#allocation5 + $0x268] sm:$0xff]  ;;  %v3937_v14 = vcombine.high %v252_v8, %v256_v9  ;;  %v260_v16 = vld [vmem:[#allocation5 + $0x280] sm:$0xff]  ;;  %v3936_v20 = vcombine.low %v252_v8, %v256_v9 }
  0xdd   :  { %2514 = vmatpush1.bf16.msra.mxu0 %v3896_v42  ;;  %2637 = vmatpush1.bf16.msra.mxu1 %v3898_v43  ;;  %v3939_v15 = vcombine.high %v253_v10, %v257_v11  ;;  %v264_v17 = vld [vmem:[#allocation5 + $0x2a0] sm:$0xff]  ;;  %v261_v18 = vld [vmem:[#allocation5 + $0x288] sm:$0xff]  ;;  %v3938_v21 = vcombine.low %v253_v10, %v257_v11 }
  0xde   :  { %2515 = vmatprep.subr.bf16.mxu0 %v3905_v44  ;;  %2638 = vmatprep.subr.bf16.mxu1 %v3907_v45  ;;  %v265_v19 = vld [vmem:[#allocation5 + $0x2a8] sm:$0xff]  ;;  %v3945_v22 = vcombine.high %v260_v16, %v264_v17  ;;  %v268_v24 = vld [vmem:[#allocation5 + $0x2c0] sm:$0xff]  ;;  %v3944_v28 = vcombine.low %v260_v16, %v264_v17 }
  0xdf   :  { %v3947_v23 = vcombine.high %v261_v18, %v265_v19  ;;  %v272_v25 = vld [vmem:[#allocation5 + $0x2e0] sm:$0xff]  ;;  %v269_v26 = vld [vmem:[#allocation5 + $0x2c8] sm:$0xff]  ;;  %v3946_v29 = vcombine.low %v261_v18, %v265_v19 }
  0xe0   :  { %v273_v27 = vld [vmem:[#allocation5 + $0x2e8] sm:$0xff]  ;;  %v3953_v30 = vcombine.high %v268_v24, %v272_v25  ;;  %v276_v32 = vld [vmem:[#allocation5 + $0x300] sm:$0xff]  ;;  %v3952_v36 = vcombine.low %v268_v24, %v272_v25 }
  0xe1   :  { %2516 = vmatpush1.bf16.msra.mxu0 %v3904_v50  ;;  %2639 = vmatpush1.bf16.msra.mxu1 %v3906_v51  ;;  %v3955_v31 = vcombine.high %v269_v26, %v273_v27  ;;  %v280_v33 = vld [vmem:[#allocation5 + $0x320] sm:$0xff]  ;;  %v277_v34 = vld [vmem:[#allocation5 + $0x308] sm:$0xff]  ;;  %v3954_v37 = vcombine.low %v269_v26, %v273_v27 }
  0xe2   :  { %2517 = vmatprep.subr.bf16.mxu0 %v3913_v52  ;;  %2640 = vmatprep.subr.bf16.mxu1 %v3915_v54  ;;  %v281_v35 = vld [vmem:[#allocation5 + $0x328] sm:$0xff]  ;;  %v3961_v38 = vcombine.high %v276_v32, %v280_v33  ;;  %v284_v40 = vld [vmem:[#allocation5 + $0x340] sm:$0xff]  ;;  %v3960_v44 = vcombine.low %v276_v32, %v280_v33 }
  0xe3   :  { %v3963_v39 = vcombine.high %v277_v34, %v281_v35  ;;  %v288_v41 = vld [vmem:[#allocation5 + $0x360] sm:$0xff]  ;;  %v285_v42 = vld [vmem:[#allocation5 + $0x348] sm:$0xff]  ;;  %v3962_v45 = vcombine.low %v277_v34, %v281_v35 }
  0xe4   :  { %v289_v43 = vld [vmem:[#allocation5 + $0x368] sm:$0xff]  ;;  %v3969_v46 = vcombine.high %v284_v40, %v288_v41  ;;  %v292_v48 = vld [vmem:[#allocation5 + $0x380] sm:$0xff]  ;;  %v3968_v52 = vcombine.low %v284_v40, %v288_v41 }
  0xe5   :  { %2518 = vmatpush1.bf16.msra.mxu0 %v3912_v60  ;;  %2641 = vmatpush1.bf16.msra.mxu1 %v3914_v61  ;;  %v3971_v47 = vcombine.high %v285_v42, %v289_v43  ;;  %v296_v49 = vld [vmem:[#allocation5 + $0x3a0] sm:$0xff]  ;;  %v293_v50 = vld [vmem:[#allocation5 + $0x388] sm:$0xff]  ;;  %v3970_v54 = vcombine.low %v285_v42, %v289_v43 }
  0xe6   :  { %2519 = vmatprep.subr.bf16.mxu0 %v3921_v62  ;;  %2642 = vmatprep.subr.bf16.mxu1 %v3923_v63  ;;  %v297_v51 = vld [vmem:[#allocation5 + $0x3a8] sm:$0xff]  ;;  %v3977_v55 = vcombine.high %v292_v48, %v296_v49  ;;  %v300_v58 = vld [vmem:[#allocation5 + $0x3c0] sm:$0xff]  ;;  %v3976_v62 = vcombine.low %v292_v48, %v296_v49 }
  0xe7   :  { %v3979_v56 = vcombine.high %v293_v50, %v297_v51  ;;  %v304_v59 = vld [vmem:[#allocation5 + $0x3e0] sm:$0xff]  ;;  %v301_v60 = vld [vmem:[#allocation5 + $0x3c8] sm:$0xff]  ;;  %v3978_v63 = vcombine.low %v293_v50, %v297_v51 }
  0xe8   :  { %v305_v61 = vld [vmem:[#allocation5 + $0x3e8] sm:$0xff]  ;;  %v3985_v0 = vcombine.high %v300_v58, %v304_v59  ;;  %v308_v2 = vld [vmem:[#allocation5 + $0x400] sm:$0xff] }
  0xe9   :  { %2520 = vmatpush1.bf16.msra.mxu0 %v3920_v4  ;;  %2643 = vmatpush1.bf16.msra.mxu1 %v3922_v5  ;;  %v3987_v1 = vcombine.high %v301_v60, %v305_v61  ;;  %v312_v3 = vld [vmem:[#allocation5 + $0x420] sm:$0xff]  ;;  %v309_v4 = vld [vmem:[#allocation5 + $0x408] sm:$0xff] }
  0xea   :  { %2521 = vmatprep.subr.bf16.mxu0 %v3929_v6  ;;  %2644 = vmatprep.subr.bf16.mxu1 %v3931_v7  ;;  %v313_v5 = vld [vmem:[#allocation5 + $0x428] sm:$0xff]  ;;  %v3984_v6 = vcombine.low %v300_v58, %v304_v59  ;;  %v3986_v7 = vcombine.low %v301_v60, %v305_v61  ;;  %v3993_v8 = vcombine.high %v308_v2, %v312_v3  ;;  %v316_v10 = vld [vmem:[#allocation5 + $0x440] sm:$0xff] }
  0xeb   :  { %v3995_v9 = vcombine.high %v309_v4, %v313_v5  ;;  %v320_v11 = vld [vmem:[#allocation5 + $0x460] sm:$0xff]  ;;  %v3992_v16 = vcombine.low %v308_v2, %v312_v3  ;;  %v3994_v17 = vcombine.low %v309_v4, %v313_v5 }
  0xec   :  { %v4001_v18 = vcombine.high %v316_v10, %v320_v11  ;;  %v324_v19 = vld [vmem:[#allocation5 + $0x480] sm:$0xff]  ;;  %v4000_v24 = vcombine.low %v316_v10, %v320_v11 }
  0xed   :  { %2522 = vmatpush1.bf16.msra.mxu0 %v3928_v12  ;;  %2645 = vmatpush1.bf16.msra.mxu1 %v3930_v13  ;;  %v5114_v12 = vcombine.low %v5104_v53, %v5104_v53  ;;  %v317_v13 = vld [vmem:[#allocation5 + $0x448] sm:$0xff]  ;;  %v332_v27 = vld [vmem:[#allocation5 + $0x4c0] sm:$0xff] }
  0xee   :  { %2523 = vmatprep.subr.bf16.mxu0 %v3937_v14  ;;  %2646 = vmatprep.subr.bf16.mxu1 %v3939_v15  ;;  %v321_v14 = vld [vmem:[#allocation5 + $0x468] sm:$0xff]  ;;  %v5116_v15 = vld [vmem:[#allocation2 + $0x8] sm:$0xff]  ;;  %v340_v35 = vld [vmem:[#allocation5 + $0x500] sm:$0xff] }
  0xef   :  { %v5120_v53 = vcombine.high %v5116_v15, %v5116_v15  ;;  %v4002_v25 = vcombine.low %v317_v13, %v321_v14  ;;  %v348_v43 = vld [vmem:[#allocation5 + $0x540] sm:$0xff] }
  0xf0   :  { %v356_v51 = vld [vmem:[#allocation5 + $0x580] sm:$0xff] }
  0xf1   :  { %2524 = vmatpush1.bf16.msra.mxu0 %v3936_v20  ;;  %2647 = vmatpush1.bf16.msra.mxu1 %v3938_v21  ;;  %v328_v20 = vld [vmem:[#allocation5 + $0x4a0] sm:$0xff]  ;;  %v325_v21 = vld [vmem:[#allocation5 + $0x488] sm:$0xff] }
  0xf2   :  { %2525 = vmatprep.subr.bf16.mxu0 %v3945_v22  ;;  %2648 = vmatprep.subr.bf16.mxu1 %v3947_v23  ;;  %v4003_v22 = vcombine.high %v317_v13, %v321_v14  ;;  %v329_v23 = vld [vmem:[#allocation5 + $0x4a8] sm:$0xff]  ;;  %v4009_v26 = vcombine.high %v324_v19, %v328_v20  ;;  %v4008_v32 = vcombine.low %v324_v19, %v328_v20  ;;  %v364_v61 = vld [vmem:[#allocation5 + $0x5c0] sm:$0xff] }
  0xf3   :  { %v4010_v33 = vcombine.low %v325_v21, %v329_v23  ;;  %v372_v5 = vld [vmem:[#allocation5 + $0x600] sm:$0xff]  ;;  %v385_v19 = vld [vmem:[#allocation5 + $0x668] sm:$0xff] }
  0xf4   :  { %v380_v14 = vld [vmem:[#allocation5 + $0x640] sm:$0xff] }
  0xf5   :  { %2526 = vmatpush1.bf16.msra.mxu0 %v3944_v28  ;;  %2649 = vmatpush1.bf16.msra.mxu1 %v3946_v29  ;;  %v336_v28 = vld [vmem:[#allocation5 + $0x4e0] sm:$0xff]  ;;  %v333_v29 = vld [vmem:[#allocation5 + $0x4c8] sm:$0xff] }
  0xf6   :  { %2527 = vmatprep.subr.bf16.mxu0 %v3953_v30  ;;  %2650 = vmatprep.subr.bf16.mxu1 %v3955_v31  ;;  %v4011_v30 = vcombine.high %v325_v21, %v329_v23  ;;  %v337_v31 = vld [vmem:[#allocation5 + $0x4e8] sm:$0xff]  ;;  %v4017_v34 = vcombine.high %v332_v27, %v336_v28  ;;  %v4016_v40 = vcombine.low %v332_v27, %v336_v28  ;;  %v388_v23 = vld [vmem:[#allocation5 + $0x680] sm:$0xff] }
  0xf7   :  { %v4018_v41 = vcombine.low %v333_v29, %v337_v31  ;;  %v393_v27 = vld [vmem:[#allocation5 + $0x6a8] sm:$0xff] }
  0xf9   :  { %2528 = vmatpush1.bf16.msra.mxu0 %v3952_v36  ;;  %2651 = vmatpush1.bf16.msra.mxu1 %v3954_v37  ;;  %v344_v36 = vld [vmem:[#allocation5 + $0x520] sm:$0xff]  ;;  %v341_v37 = vld [vmem:[#allocation5 + $0x508] sm:$0xff] }
  0xfa   :  { %2529 = vmatprep.subr.bf16.mxu0 %v3961_v38  ;;  %2652 = vmatprep.subr.bf16.mxu1 %v3963_v39  ;;  %v4019_v38 = vcombine.high %v333_v29, %v337_v31  ;;  %v345_v39 = vld [vmem:[#allocation5 + $0x528] sm:$0xff]  ;;  %v4025_v42 = vcombine.high %v340_v35, %v344_v36  ;;  %v4024_v48 = vcombine.low %v340_v35, %v344_v36  ;;  %v396_v31 = vld [vmem:[#allocation5 + $0x6c0] sm:$0xff] }
  0xfb   :  { %v4026_v49 = vcombine.low %v341_v37, %v345_v39  ;;  %v401_v35 = vld [vmem:[#allocation5 + $0x6e8] sm:$0xff] }
  0xfd   :  { %2530 = vmatpush1.bf16.msra.mxu0 %v3960_v44  ;;  %2653 = vmatpush1.bf16.msra.mxu1 %v3962_v45  ;;  %v352_v44 = vld [vmem:[#allocation5 + $0x560] sm:$0xff]  ;;  %v349_v45 = vld [vmem:[#allocation5 + $0x548] sm:$0xff] }
  0xfe   :  { %2531 = vmatprep.subr.bf16.mxu0 %v3969_v46  ;;  %2654 = vmatprep.subr.bf16.mxu1 %v3971_v47  ;;  %v4027_v46 = vcombine.high %v341_v37, %v345_v39  ;;  %v353_v47 = vld [vmem:[#allocation5 + $0x568] sm:$0xff]  ;;  %v4033_v50 = vcombine.high %v348_v43, %v352_v44  ;;  %v4032_v58 = vcombine.low %v348_v43, %v352_v44  ;;  %v404_v39 = vld [vmem:[#allocation5 + $0x700] sm:$0xff] }
  0xff   :  { %v4034_v59 = vcombine.low %v349_v45, %v353_v47  ;;  %v409_v43 = vld [vmem:[#allocation5 + $0x728] sm:$0xff] }
 0x101   :  { %2532 = vmatpush1.bf16.msra.mxu0 %v3968_v52  ;;  %2655 = vmatpush1.bf16.msra.mxu1 %v3970_v54  ;;  %v360_v52 = vld [vmem:[#allocation5 + $0x5a0] sm:$0xff]  ;;  %v357_v54 = vld [vmem:[#allocation5 + $0x588] sm:$0xff] }
 0x102   :  { %2533 = vmatprep.subr.bf16.mxu0 %v3977_v55  ;;  %2656 = vmatprep.subr.bf16.mxu1 %v3979_v56  ;;  %v4035_v55 = vcombine.high %v349_v45, %v353_v47  ;;  %v361_v56 = vld [vmem:[#allocation5 + $0x5a8] sm:$0xff]  ;;  %v4041_v60 = vcombine.high %v356_v51, %v360_v52  ;;  %v4040_v2 = vcombine.low %v356_v51, %v360_v52  ;;  %v412_v47 = vld [vmem:[#allocation5 + $0x740] sm:$0xff] }
 0x103   :  { %v4042_v3 = vcombine.low %v357_v54, %v361_v56  ;;  %v417_v51 = vld [vmem:[#allocation5 + $0x768] sm:$0xff] }
 0x105   :  { %2534 = vmatpush1.bf16.msra.mxu0 %v3976_v62  ;;  %2657 = vmatpush1.bf16.msra.mxu1 %v3978_v63  ;;  %v368_v62 = vld [vmem:[#allocation5 + $0x5e0] sm:$0xff]  ;;  %v365_v63 = vld [vmem:[#allocation5 + $0x5c8] sm:$0xff] }
 0x106   :  { %2535 = vmatprep.subr.bf16.mxu0 %v3985_v0  ;;  %2658 = vmatprep.subr.bf16.mxu1 %v3987_v1  ;;  %v4043_v0 = vcombine.high %v357_v54, %v361_v56  ;;  %v369_v1 = vld [vmem:[#allocation5 + $0x5e8] sm:$0xff]  ;;  %v4049_v4 = vcombine.high %v364_v61, %v368_v62  ;;  %v4048_v10 = vcombine.low %v364_v61, %v368_v62  ;;  %v420_v56 = vld [vmem:[#allocation5 + $0x780] sm:$0xff] }
 0x107   :  { %v4050_v11 = vcombine.low %v365_v63, %v369_v1  ;;  %v425_v61 = vld [vmem:[#allocation5 + $0x7a8] sm:$0xff] }
 0x109   :  { %2536 = vmatpush1.bf16.msra.mxu0 %v3984_v6  ;;  %2659 = vmatpush1.bf16.msra.mxu1 %v3986_v7  ;;  %v376_v6 = vld [vmem:[#allocation5 + $0x620] sm:$0xff]  ;;  %v373_v7 = vld [vmem:[#allocation5 + $0x608] sm:$0xff] }
 0x10a   :  { %2546 = vmatprep.subr.bf16.mxu0 %v3993_v8  ;;  %2669 = vmatprep.subr.bf16.mxu1 %v3995_v9  ;;  %v4051_v8 = vcombine.high %v365_v63, %v369_v1  ;;  %v377_v9 = vld [vmem:[#allocation5 + $0x628] sm:$0xff]  ;;  %v4057_v13 = vcombine.high %v372_v5, %v376_v6  ;;  %v4056_v20 = vcombine.low %v372_v5, %v376_v6  ;;  %v428_v1 = vld [vmem:[#allocation5 + $0x7c0] sm:$0xff] }
 0x10b   :  { %v4058_v21 = vcombine.low %v373_v7, %v377_v9  ;;  %v433_v5 = vld [vmem:[#allocation5 + $0x7e8] sm:$0xff] }
 0x10c   :  { %2538 = vmatmul.mubr.bf16.vlgmr.msra.gmra.mrb[0].mxu0 %v5114_v12  ;;  %2661 = vmatmul.mubr.bf16.vlgmr.msra.gmra.mrb[0].mxu1 %v5114_v12 }
 0x10d   :  { %2547 = vmatpush1.bf16.msra.mxu0 %v3992_v16  ;;  %2670 = vmatpush1.bf16.msra.mxu1 %v3994_v17  ;;  %v384_v16 = vld [vmem:[#allocation5 + $0x660] sm:$0xff]  ;;  %v381_v17 = vld [vmem:[#allocation5 + $0x648] sm:$0xff] }
 0x10e   :  { %2548 = vmatprep.subr.bf16.mxu0 %v4001_v18  ;;  %2671 = vmatprep.subr.bf16.mxu1 %v4003_v22  ;;  %v4059_v18 = vcombine.high %v373_v7, %v377_v9  ;;  %v4065_v22 = vcombine.high %v380_v14, %v384_v16  ;;  %v4064_v28 = vcombine.low %v380_v14, %v384_v16  ;;  %v441_v14 = vld [vmem:[#allocation5 + $0x828] sm:$0xff] }
 0x10f   :  { %2578 = vmatprep.mubr.bf16.mxu0 %v5120_v53  ;;  %2701 = vmatprep.mubr.bf16.mxu1 %v5120_v53  ;;  %v4066_v29 = vcombine.low %v381_v17, %v385_v19 }
 0x111   :  { %2549 = vmatpush1.bf16.msra.mxu0 %v4000_v24  ;;  %2672 = vmatpush1.bf16.msra.mxu1 %v4002_v25  ;;  %v392_v24 = vld [vmem:[#allocation5 + $0x6a0] sm:$0xff]  ;;  %v389_v25 = vld [vmem:[#allocation5 + $0x688] sm:$0xff] }
 0x112   :  { %2550 = vmatprep.subr.bf16.mxu0 %v4009_v26  ;;  %2673 = vmatprep.subr.bf16.mxu1 %v4011_v30  ;;  %v4067_v26 = vcombine.high %v381_v17, %v385_v19  ;;  %v4073_v30 = vcombine.high %v388_v23, %v392_v24  ;;  %v4072_v36 = vcombine.low %v388_v23, %v392_v24  ;;  %v445_v23 = vld [vmem:[#allocation5 + $0x848] sm:$0xff] }
 0x113   :  { %v4074_v37 = vcombine.low %v389_v25, %v393_v27  ;;  %v449_v24 = vld [vmem:[#allocation5 + $0x868] sm:$0xff] }
 0x115   :  { %2551 = vmatpush1.bf16.msra.mxu0 %v4008_v32  ;;  %2674 = vmatpush1.bf16.msra.mxu1 %v4010_v33  ;;  %v400_v32 = vld [vmem:[#allocation5 + $0x6e0] sm:$0xff]  ;;  %v397_v33 = vld [vmem:[#allocation5 + $0x6c8] sm:$0xff] }
 0x116   :  { %2552 = vmatprep.subr.bf16.mxu0 %v4017_v34  ;;  %2675 = vmatprep.subr.bf16.mxu1 %v4019_v38  ;;  %v4075_v34 = vcombine.high %v389_v25, %v393_v27  ;;  %v4081_v38 = vcombine.high %v396_v31, %v400_v32  ;;  %v4080_v44 = vcombine.low %v396_v31, %v400_v32  ;;  %v5130_v25 = vld [vmem:[#allocation2 + $0x10] sm:$0xff]  ;;  %v456_v31 = vld [vmem:[#allocation5 + $0x8a0] sm:$0xff] }
 0x117   :  { %v4082_v45 = vcombine.low %v397_v33, %v401_v35  ;;  %v5134_v32 = vcombine.high %v5130_v25, %v5130_v25 }
 0x119   :  { %2553 = vmatpush1.bf16.msra.mxu0 %v4016_v40  ;;  %2676 = vmatpush1.bf16.msra.mxu1 %v4018_v41  ;;  %v408_v40 = vld [vmem:[#allocation5 + $0x720] sm:$0xff]  ;;  %v405_v41 = vld [vmem:[#allocation5 + $0x708] sm:$0xff] }
 0x11a   :  { %2554 = vmatprep.subr.bf16.mxu0 %v4025_v42  ;;  %2677 = vmatprep.subr.bf16.mxu1 %v4027_v46  ;;  %v4083_v42 = vcombine.high %v397_v33, %v401_v35  ;;  %v4089_v46 = vcombine.high %v404_v39, %v408_v40  ;;  %v4088_v52 = vcombine.low %v404_v39, %v408_v40  ;;  %v457_v33 = vld [vmem:[#allocation5 + $0x8a8] sm:$0xff]  ;;  %v464_v39 = vld [vmem:[#allocation5 + $0x8e0] sm:$0xff] }
 0x11b   :  { %v4090_v54 = vcombine.low %v405_v41, %v409_v43  ;;  %v4130_v35 = vcombine.low %v445_v23, %v449_v24  ;;  %v461_v40 = vld [vmem:[#allocation5 + $0x8c8] sm:$0xff] }
 0x11d   :  { %2555 = vmatpush1.bf16.msra.mxu0 %v4024_v48  ;;  %2678 = vmatpush1.bf16.msra.mxu1 %v4026_v49  ;;  %v416_v48 = vld [vmem:[#allocation5 + $0x760] sm:$0xff]  ;;  %v413_v49 = vld [vmem:[#allocation5 + $0x748] sm:$0xff] }
 0x11e   :  { %2556 = vmatprep.subr.bf16.mxu0 %v4033_v50  ;;  %2679 = vmatprep.subr.bf16.mxu1 %v4035_v55  ;;  %v4091_v50 = vcombine.high %v405_v41, %v409_v43  ;;  %v4097_v55 = vcombine.high %v412_v47, %v416_v48  ;;  %v4096_v62 = vcombine.low %v412_v47, %v416_v48  ;;  %v465_v41 = vld [vmem:[#allocation5 + $0x8e8] sm:$0xff]  ;;  %v472_v47 = vld [vmem:[#allocation5 + $0x920] sm:$0xff] }
 0x11f   :  { %v4098_v63 = vcombine.low %v413_v49, %v417_v51  ;;  %v469_v48 = vld [vmem:[#allocation5 + $0x908] sm:$0xff] }
 0x121   :  { %2557 = vmatpush1.bf16.msra.mxu0 %v4032_v58  ;;  %2680 = vmatpush1.bf16.msra.mxu1 %v4034_v59  ;;  %v424_v58 = vld [vmem:[#allocation5 + $0x7a0] sm:$0xff]  ;;  %v421_v59 = vld [vmem:[#allocation5 + $0x788] sm:$0xff] }
 0x122   :  { %2558 = vmatprep.subr.bf16.mxu0 %v4041_v60  ;;  %2681 = vmatprep.subr.bf16.mxu1 %v4043_v0  ;;  %v4099_v60 = vcombine.high %v413_v49, %v417_v51  ;;  %v4105_v0 = vcombine.high %v420_v56, %v424_v58  ;;  %v4104_v6 = vcombine.low %v420_v56, %v424_v58  ;;  %v473_v49 = vld [vmem:[#allocation5 + $0x928] sm:$0xff]  ;;  %v480_v56 = vld [vmem:[#allocation5 + $0x960] sm:$0xff] }
 0x123   :  { %v4106_v7 = vcombine.low %v421_v59, %v425_v61  ;;  %v4146_v51 = vcombine.low %v461_v40, %v465_v41  ;;  %v477_v58 = vld [vmem:[#allocation5 + $0x948] sm:$0xff] }
 0x125   :  { %2559 = vmatpush1.bf16.msra.mxu0 %v4040_v2  ;;  %2682 = vmatpush1.bf16.msra.mxu1 %v4042_v3  ;;  %v432_v2 = vld [vmem:[#allocation5 + $0x7e0] sm:$0xff]  ;;  %v429_v3 = vld [vmem:[#allocation5 + $0x7c8] sm:$0xff] }
 0x126   :  { %2560 = vmatprep.subr.bf16.mxu0 %v4049_v4  ;;  %2683 = vmatprep.subr.bf16.mxu1 %v4051_v8  ;;  %v4107_v4 = vcombine.high %v421_v59, %v425_v61  ;;  %v4113_v8 = vcombine.high %v428_v1, %v432_v2  ;;  %v4115_v9 = vcombine.high %v429_v3, %v433_v5  ;;  %v481_v59 = vld [vmem:[#allocation5 + $0x968] sm:$0xff] }
 0x127   :  { %v4112_v16 = vcombine.low %v428_v1, %v432_v2  ;;  %v4114_v17 = vcombine.low %v429_v3, %v433_v5  ;;  %v4154_v61 = vcombine.low %v469_v48, %v473_v49  ;;  %v488_v1 = vld [vmem:[#allocation5 + $0x9a0] sm:$0xff]  ;;  %v485_v2 = vld [vmem:[#allocation5 + $0x988] sm:$0xff]  ;;  %v4162_v5 = vcombine.low %v477_v58, %v481_v59 }
 0x128   :  { %v489_v3 = vld [vmem:[#allocation5 + $0x9a8] sm:$0xff] }
 0x129   :  { %2561 = vmatpush1.bf16.msra.mxu0 %v4048_v10  ;;  %2684 = vmatpush1.bf16.msra.mxu1 %v4050_v11  ;;  %v436_v10 = vld [vmem:[#allocation5 + $0x800] sm:$0xff] }
 0x12a   :  { %2562 = vmatprep.subr.bf16.mxu0 %v4057_v13  ;;  %2685 = vmatprep.subr.bf16.mxu1 %v4059_v18  ;;  %v440_v11 = vld [vmem:[#allocation5 + $0x820] sm:$0xff]  ;;  %v437_v13 = vld [vmem:[#allocation5 + $0x808] sm:$0xff] }
 0x12b   :  { %v4121_v18 = vcombine.high %v436_v10, %v440_v11  ;;  %v4123_v19 = vcombine.high %v437_v13, %v441_v14  ;;  %v4122_v27 = vcombine.low %v437_v13, %v441_v14  ;;  %v4170_v14 = vcombine.low %v485_v2, %v489_v3 }
 0x12d   :  { %2563 = vmatpush1.bf16.msra.mxu0 %v4056_v20  ;;  %2686 = vmatpush1.bf16.msra.mxu1 %v4058_v21  ;;  %v444_v20 = vld [vmem:[#allocation5 + $0x840] sm:$0xff] }
 0x12e   :  { %2564 = vmatprep.subr.bf16.mxu0 %v4065_v22  ;;  %2687 = vmatprep.subr.bf16.mxu1 %v4067_v26  ;;  %v448_v21 = vld [vmem:[#allocation5 + $0x860] sm:$0xff]  ;;  %v5128_v22 = vcombine.low %v5116_v15, %v5116_v15  ;;  %v4120_v26 = vcombine.low %v436_v10, %v440_v11  ;;  %v453_v15 = vld [vmem:[#allocation5 + $0x888] sm:$0xff] }
 0x12f   :  { %v4138_v43 = vcombine.low %v453_v15, %v457_v33  ;;  %v493_v10 = vld [vmem:[#allocation5 + $0x9c8] sm:$0xff] }
 0x130   :  { %v497_v11 = vld [vmem:[#allocation5 + $0x9e8] sm:$0xff] }
 0x131   :  { %2565 = vmatpush1.bf16.msra.mxu0 %v4064_v28  ;;  %2688 = vmatpush1.bf16.msra.mxu1 %v4066_v29  ;;  %v4129_v28 = vcombine.high %v444_v20, %v448_v21  ;;  %v4131_v29 = vcombine.high %v445_v23, %v449_v24  ;;  %v4178_v24 = vcombine.low %v493_v10, %v497_v11 }
 0x132   :  { %2566 = vmatprep.subr.bf16.mxu0 %v4073_v30  ;;  %2689 = vmatprep.subr.bf16.mxu1 %v4075_v34  ;;  %v452_v30 = vld [vmem:[#allocation5 + $0x880] sm:$0xff]  ;;  %v4128_v34 = vcombine.low %v444_v20, %v448_v21  ;;  %v501_v20 = vld [vmem:[#allocation5 + $0xa08] sm:$0xff] }
 0x133   :  { %v505_v21 = vld [vmem:[#allocation5 + $0xa28] sm:$0xff] }
 0x135   :  { %2567 = vmatpush1.bf16.msra.mxu0 %v4072_v36  ;;  %2690 = vmatpush1.bf16.msra.mxu1 %v4074_v37  ;;  %v4137_v36 = vcombine.high %v452_v30, %v456_v31  ;;  %v4139_v37 = vcombine.high %v453_v15, %v457_v33  ;;  %v4186_v33 = vcombine.low %v501_v20, %v505_v21 }
 0x136   :  { %2568 = vmatprep.subr.bf16.mxu0 %v4081_v38  ;;  %2691 = vmatprep.subr.bf16.mxu1 %v4083_v42  ;;  %v460_v38 = vld [vmem:[#allocation5 + $0x8c0] sm:$0xff]  ;;  %v4136_v42 = vcombine.low %v452_v30, %v456_v31  ;;  %v509_v30 = vld [vmem:[#allocation5 + $0xa48] sm:$0xff] }
 0x137   :  { %v513_v31 = vld [vmem:[#allocation5 + $0xa68] sm:$0xff] }
 0x139   :  { %2569 = vmatpush1.bf16.msra.mxu0 %v4080_v44  ;;  %2692 = vmatpush1.bf16.msra.mxu1 %v4082_v45  ;;  %v4145_v44 = vcombine.high %v460_v38, %v464_v39  ;;  %v4147_v45 = vcombine.high %v461_v40, %v465_v41  ;;  %v4194_v41 = vcombine.low %v509_v30, %v513_v31 }
 0x13a   :  { %2570 = vmatprep.subr.bf16.mxu0 %v4089_v46  ;;  %2693 = vmatprep.subr.bf16.mxu1 %v4091_v50  ;;  %v468_v46 = vld [vmem:[#allocation5 + $0x900] sm:$0xff]  ;;  %v4144_v50 = vcombine.low %v460_v38, %v464_v39  ;;  %v517_v38 = vld [vmem:[#allocation5 + $0xa88] sm:$0xff] }
 0x13b   :  { %v521_v39 = vld [vmem:[#allocation5 + $0xaa8] sm:$0xff] }
 0x13d   :  { %2571 = vmatpush1.bf16.msra.mxu0 %v4088_v52  ;;  %2694 = vmatpush1.bf16.msra.mxu1 %v4090_v54  ;;  %v4153_v52 = vcombine.high %v468_v46, %v472_v47  ;;  %v4155_v54 = vcombine.high %v469_v48, %v473_v49  ;;  %v4202_v49 = vcombine.low %v517_v38, %v521_v39 }
 0x13e   :  { %2572 = vmatprep.subr.bf16.mxu0 %v4097_v55  ;;  %2695 = vmatprep.subr.bf16.mxu1 %v4099_v60  ;;  %v476_v55 = vld [vmem:[#allocation5 + $0x940] sm:$0xff]  ;;  %v4152_v60 = vcombine.low %v468_v46, %v472_v47  ;;  %v525_v46 = vld [vmem:[#allocation5 + $0xac8] sm:$0xff] }
 0x13f   :  { %v529_v47 = vld [vmem:[#allocation5 + $0xae8] sm:$0xff] }
 0x141   :  { %2573 = vmatpush1.bf16.msra.mxu0 %v4096_v62  ;;  %2696 = vmatpush1.bf16.msra.mxu1 %v4098_v63  ;;  %v4161_v62 = vcombine.high %v476_v55, %v480_v56  ;;  %v4163_v63 = vcombine.high %v477_v58, %v481_v59  ;;  %v4210_v59 = vcombine.low %v525_v46, %v529_v47 }
 0x142   :  { %2574 = vmatprep.subr.bf16.mxu0 %v4105_v0  ;;  %2697 = vmatprep.subr.bf16.mxu1 %v4107_v4  ;;  %v484_v0 = vld [vmem:[#allocation5 + $0x980] sm:$0xff]  ;;  %v4160_v4 = vcombine.low %v476_v55, %v480_v56  ;;  %v533_v55 = vld [vmem:[#allocation5 + $0xb08] sm:$0xff] }
 0x143   :  { %v4168_v13 = vcombine.low %v484_v0, %v488_v1  ;;  %v537_v56 = vld [vmem:[#allocation5 + $0xb28] sm:$0xff] }
 0x145   :  { %2575 = vmatpush1.bf16.msra.mxu0 %v4104_v6  ;;  %2698 = vmatpush1.bf16.msra.mxu1 %v4106_v7  ;;  %v4169_v6 = vcombine.high %v484_v0, %v488_v1  ;;  %v4171_v7 = vcombine.high %v485_v2, %v489_v3  ;;  %v541_v0 = vld [vmem:[#allocation5 + $0xb48] sm:$0xff]  ;;  %v4218_v3 = vcombine.low %v533_v55, %v537_v56 }
 0x146   :  { %2576 = vmatprep.subr.bf16.mxu0 %v4113_v8  ;;  %2699 = vmatprep.subr.bf16.mxu1 %v4115_v9  ;;  %v492_v8 = vld [vmem:[#allocation5 + $0x9c0] sm:$0xff]  ;;  %v545_v1 = vld [vmem:[#allocation5 + $0xb68] sm:$0xff] }
 0x147   :  { %v496_v9 = vld [vmem:[#allocation5 + $0x9e0] sm:$0xff] }
 0x148   :  { %v4176_v23 = vcombine.low %v492_v8, %v496_v9 }
 0x149   :  { %2577 = vmatpush1.bf16.msra.mxu0 %v4112_v16  ;;  %2700 = vmatpush1.bf16.msra.mxu1 %v4114_v17  ;;  %v4177_v16 = vcombine.high %v492_v8, %v496_v9  ;;  %v4179_v17 = vcombine.high %v493_v10, %v497_v11  ;;  %v549_v8 = vld [vmem:[#allocation5 + $0xb88] sm:$0xff]  ;;  %v4226_v11 = vcombine.low %v541_v0, %v545_v1 }
 0x14a   :  { %2587 = vmatprep.subr.bf16.mxu0 %v4121_v18  ;;  %2710 = vmatprep.subr.bf16.mxu1 %v4123_v19  ;;  %v500_v18 = vld [vmem:[#allocation5 + $0xa00] sm:$0xff]  ;;  %v553_v9 = vld [vmem:[#allocation5 + $0xba8] sm:$0xff] }
 0x14b   :  { %v504_v19 = vld [vmem:[#allocation5 + $0xa20] sm:$0xff] }
 0x14c   :  { %2579 = vmatmul.mubr.bf16.vlgmr.msra.gmra.mrb[0].mxu0 %v5128_v22  ;;  %2702 = vmatmul.mubr.bf16.vlgmr.msra.gmra.mrb[0].mxu1 %v5128_v22  ;;  %v4184_v15 = vcombine.low %v500_v18, %v504_v19 }
 0x14d   :  { %2588 = vmatpush1.bf16.msra.mxu0 %v4120_v26  ;;  %2711 = vmatpush1.bf16.msra.mxu1 %v4122_v27  ;;  %v4185_v26 = vcombine.high %v500_v18, %v504_v19  ;;  %v4187_v27 = vcombine.high %v501_v20, %v505_v21  ;;  %v557_v18 = vld [vmem:[#allocation5 + $0xbc8] sm:$0xff]  ;;  %v4234_v21 = vcombine.low %v549_v8, %v553_v9 }
 0x14e   :  { %2589 = vmatprep.subr.bf16.mxu0 %v4129_v28  ;;  %2712 = vmatprep.subr.bf16.mxu1 %v4131_v29  ;;  %v508_v28 = vld [vmem:[#allocation5 + $0xa40] sm:$0xff]  ;;  %v561_v19 = vld [vmem:[#allocation5 + $0xbe8] sm:$0xff] }
 0x14f   :  { %2619 = vmatprep.mubr.bf16.mxu0 %v5134_v32  ;;  %2742 = vmatprep.mubr.bf16.mxu1 %v5134_v32  ;;  %v512_v29 = vld [vmem:[#allocation5 + $0xa60] sm:$0xff] }
 0x150   :  { %v4192_v40 = vcombine.low %v508_v28, %v512_v29 }
 0x151   :  { %2590 = vmatpush1.bf16.msra.mxu0 %v4128_v34  ;;  %2713 = vmatpush1.bf16.msra.mxu1 %v4130_v35  ;;  %v4193_v34 = vcombine.high %v508_v28, %v512_v29  ;;  %v4195_v35 = vcombine.high %v509_v30, %v513_v31  ;;  %v183_v28 = vld [vmem:[#allocation5 + $0x18] sm:$0xff]  ;;  %v4242_v31 = vcombine.low %v557_v18, %v561_v19 }
 0x152   :  { %2591 = vmatprep.subr.bf16.mxu0 %v4137_v36  ;;  %2714 = vmatprep.subr.bf16.mxu1 %v4139_v37  ;;  %v516_v36 = vld [vmem:[#allocation5 + $0xa80] sm:$0xff]  ;;  %v187_v29 = vld [vmem:[#allocation5 + $0x38] sm:$0xff] }
 0x153   :  { %v520_v37 = vld [vmem:[#allocation5 + $0xaa0] sm:$0xff] }
 0x154   :  { %v4200_v48 = vcombine.low %v516_v36, %v520_v37 }
 0x155   :  { %2592 = vmatpush1.bf16.msra.mxu0 %v4136_v42  ;;  %2715 = vmatpush1.bf16.msra.mxu1 %v4138_v43  ;;  %v4201_v42 = vcombine.high %v516_v36, %v520_v37  ;;  %v4203_v43 = vcombine.high %v517_v38, %v521_v39  ;;  %v5142_v36 = vcombine.low %v5130_v25, %v5130_v25  ;;  %v191_v37 = vld [vmem:[#allocation5 + $0x58] sm:$0xff] }
 0x156   :  { %2593 = vmatprep.subr.bf16.mxu0 %v4145_v44  ;;  %2716 = vmatprep.subr.bf16.mxu1 %v4147_v45  ;;  %v524_v44 = vld [vmem:[#allocation5 + $0xac0] sm:$0xff]  ;;  %v195_v38 = vld [vmem:[#allocation5 + $0x78] sm:$0xff] }
 0x157   :  { %v528_v45 = vld [vmem:[#allocation5 + $0xae0] sm:$0xff] }
 0x158   :  { %v4208_v58 = vcombine.low %v524_v44, %v528_v45 }
 0x159   :  { %2594 = vmatpush1.bf16.msra.mxu0 %v4144_v50  ;;  %2717 = vmatpush1.bf16.msra.mxu1 %v4146_v51  ;;  %v4209_v50 = vcombine.high %v524_v44, %v528_v45  ;;  %v4211_v51 = vcombine.high %v525_v46, %v529_v47  ;;  %v202_v44 = vld [vmem:[#allocation5 + $0xb0] sm:$0xff]  ;;  %v199_v45 = vld [vmem:[#allocation5 + $0x98] sm:$0xff]  ;;  %v3878_v47 = vcombine.low %v191_v37, %v195_v38 }
 0x15a   :  { %2595 = vmatprep.subr.bf16.mxu0 %v4153_v52  ;;  %2718 = vmatprep.subr.bf16.mxu1 %v4155_v54  ;;  %v532_v52 = vld [vmem:[#allocation5 + $0xb00] sm:$0xff]  ;;  %v203_v46 = vld [vmem:[#allocation5 + $0xb8] sm:$0xff] }
 0x15b   :  { %v536_v54 = vld [vmem:[#allocation5 + $0xb20] sm:$0xff] }
 0x15c   :  { %v4216_v2 = vcombine.low %v532_v52, %v536_v54 }
 0x15d   :  { %2596 = vmatpush1.bf16.msra.mxu0 %v4152_v60  ;;  %2719 = vmatpush1.bf16.msra.mxu1 %v4154_v61  ;;  %v4217_v60 = vcombine.high %v532_v52, %v536_v54  ;;  %v4219_v61 = vcombine.high %v533_v55, %v537_v56  ;;  %v207_v52 = vld [vmem:[#allocation5 + $0xd8] sm:$0xff]  ;;  %v3886_v56 = vcombine.low %v199_v45, %v203_v46 }
 0x15e   :  { %2597 = vmatprep.subr.bf16.mxu0 %v4161_v62  ;;  %2720 = vmatprep.subr.bf16.mxu1 %v4163_v63  ;;  %v540_v62 = vld [vmem:[#allocation5 + $0xb40] sm:$0xff]  ;;  %v211_v54 = vld [vmem:[#allocation5 + $0xf8] sm:$0xff] }
 0x15f   :  { %v544_v63 = vld [vmem:[#allocation5 + $0xb60] sm:$0xff] }
 0x160   :  { %v4224_v10 = vcombine.low %v540_v62, %v544_v63 }
 0x161   :  { %2598 = vmatpush1.bf16.msra.mxu0 %v4160_v4  ;;  %2721 = vmatpush1.bf16.msra.mxu1 %v4162_v5  ;;  %v4225_v4 = vcombine.high %v540_v62, %v544_v63  ;;  %v4227_v5 = vcombine.high %v541_v0, %v545_v1  ;;  %v215_v62 = vld [vmem:[#allocation5 + $0x118] sm:$0xff]  ;;  %v3894_v1 = vcombine.low %v207_v52, %v211_v54 }
 0x162   :  { %2599 = vmatprep.subr.bf16.mxu0 %v4169_v6  ;;  %2722 = vmatprep.subr.bf16.mxu1 %v4171_v7  ;;  %v548_v6 = vld [vmem:[#allocation5 + $0xb80] sm:$0xff]  ;;  %v219_v63 = vld [vmem:[#allocation5 + $0x138] sm:$0xff] }
 0x163   :  { %v552_v7 = vld [vmem:[#allocation5 + $0xba0] sm:$0xff] }
 0x164   :  { %v4232_v20 = vcombine.low %v548_v6, %v552_v7 }
 0x165   :  { %2600 = vmatpush1.bf16.msra.mxu0 %v4168_v13  ;;  %2723 = vmatpush1.bf16.msra.mxu1 %v4170_v14  ;;  %v4233_v13 = vcombine.high %v548_v6, %v552_v7  ;;  %v4235_v14 = vcombine.high %v549_v8, %v553_v9  ;;  %v227_v6 = vld [vmem:[#allocation5 + $0x178] sm:$0xff]  ;;  %v3902_v8 = vcombine.low %v215_v62, %v219_v63 }
 0x166   :  { %2601 = vmatprep.subr.bf16.mxu0 %v4177_v16  ;;  %2724 = vmatprep.subr.bf16.mxu1 %v4179_v17  ;;  %v556_v16 = vld [vmem:[#allocation5 + $0xbc0] sm:$0xff] }
 0x167   :  { %v560_v17 = vld [vmem:[#allocation5 + $0xbe0] sm:$0xff] }
 0x168   :  { %v4240_v30 = vcombine.low %v556_v16, %v560_v17 }
 0x169   :  { %2602 = vmatpush1.bf16.msra.mxu0 %v4176_v23  ;;  %2725 = vmatpush1.bf16.msra.mxu1 %v4178_v24  ;;  %v4241_v23 = vcombine.high %v556_v16, %v560_v17  ;;  %v4243_v24 = vcombine.high %v557_v18, %v561_v19  ;;  %v235_v16 = vld [vmem:[#allocation5 + $0x1b8] sm:$0xff] }
 0x16a   :  { %2603 = vmatprep.subr.bf16.mxu0 %v4185_v26  ;;  %2726 = vmatprep.subr.bf16.mxu1 %v4187_v27  ;;  %v182_v26 = vld [vmem:[#allocation5 + $0x10] sm:$0xff] }
 0x16b   :  { %v186_v27 = vld [vmem:[#allocation5 + $0x30] sm:$0xff] }
 0x16c   :  { %v3868_v39 = vcombine.low %v182_v26, %v186_v27 }
 0x16d   :  { %2604 = vmatpush1.bf16.msra.mxu0 %v4184_v15  ;;  %2727 = vmatpush1.bf16.msra.mxu1 %v4186_v33  ;;  %v3869_v15 = vcombine.high %v182_v26, %v186_v27  ;;  %v3871_v33 = vcombine.high %v183_v28, %v187_v29  ;;  %v243_v26 = vld [vmem:[#allocation5 + $0x1f8] sm:$0xff] }
 0x16e   :  { %2605 = vmatprep.subr.bf16.mxu0 %v4193_v34  ;;  %2728 = vmatprep.subr.bf16.mxu1 %v4195_v35  ;;  %v190_v34 = vld [vmem:[#allocation5 + $0x50] sm:$0xff] }
 0x16f   :  { %v194_v35 = vld [vmem:[#allocation5 + $0x70] sm:$0xff] }
 0x170   :  { %v3876_v25 = vcombine.low %v190_v34, %v194_v35 }
 0x171   :  { %2606 = vmatpush1.bf16.msra.mxu0 %v4192_v40  ;;  %2729 = vmatpush1.bf16.msra.mxu1 %v4194_v41  ;;  %v3870_v40 = vcombine.low %v183_v28, %v187_v29  ;;  %v3877_v41 = vcombine.high %v190_v34, %v194_v35  ;;  %v251_v34 = vld [vmem:[#allocation5 + $0x238] sm:$0xff] }
 0x172   :  { %2607 = vmatprep.subr.bf16.mxu0 %v4201_v42  ;;  %2730 = vmatprep.subr.bf16.mxu1 %v4203_v43  ;;  %v3879_v42 = vcombine.high %v191_v37, %v195_v38  ;;  %v198_v43 = vld [vmem:[#allocation5 + $0x90] sm:$0xff] }
 0x173   :  { %v3884_v55 = vcombine.low %v198_v43, %v202_v44 }
 0x175   :  { %2608 = vmatpush1.bf16.msra.mxu0 %v4200_v48  ;;  %2731 = vmatpush1.bf16.msra.mxu1 %v4202_v49  ;;  %v3885_v48 = vcombine.high %v198_v43, %v202_v44  ;;  %v3887_v49 = vcombine.high %v199_v45, %v203_v46  ;;  %v259_v43 = vld [vmem:[#allocation5 + $0x278] sm:$0xff] }
 0x176   :  { %2609 = vmatprep.subr.bf16.mxu0 %v4209_v50  ;;  %2732 = vmatprep.subr.bf16.mxu1 %v4211_v51  ;;  %v206_v50 = vld [vmem:[#allocation5 + $0xd0] sm:$0xff] }
 0x177   :  { %v210_v51 = vld [vmem:[#allocation5 + $0xf0] sm:$0xff] }
 0x178   :  { %v3892_v0 = vcombine.low %v206_v50, %v210_v51 }
 0x179   :  { %2610 = vmatpush1.bf16.msra.mxu0 %v4208_v58  ;;  %2733 = vmatpush1.bf16.msra.mxu1 %v4210_v59  ;;  %v3893_v58 = vcombine.high %v206_v50, %v210_v51  ;;  %v3895_v59 = vcombine.high %v207_v52, %v211_v54  ;;  %v267_v50 = vld [vmem:[#allocation5 + $0x2b8] sm:$0xff] }
 0x17a   :  { %2611 = vmatprep.subr.bf16.mxu0 %v4217_v60  ;;  %2734 = vmatprep.subr.bf16.mxu1 %v4219_v61  ;;  %v214_v60 = vld [vmem:[#allocation5 + $0x110] sm:$0xff] }
 0x17b   :  { %v218_v61 = vld [vmem:[#allocation5 + $0x130] sm:$0xff] }
 0x17c   :  { %v3900_v7 = vcombine.low %v214_v60, %v218_v61 }
 0x17d   :  { %2612 = vmatpush1.bf16.msra.mxu0 %v4216_v2  ;;  %2735 = vmatpush1.bf16.msra.mxu1 %v4218_v3  ;;  %v3901_v2 = vcombine.high %v214_v60, %v218_v61  ;;  %v222_v3 = vld [vmem:[#allocation5 + $0x150] sm:$0xff]  ;;  %v275_v60 = vld [vmem:[#allocation5 + $0x2f8] sm:$0xff] }
 0x17e   :  { %2613 = vmatprep.subr.bf16.mxu0 %v4225_v4  ;;  %2736 = vmatprep.subr.bf16.mxu1 %v4227_v5  ;;  %v226_v4 = vld [vmem:[#allocation5 + $0x170] sm:$0xff]  ;;  %v223_v5 = vld [vmem:[#allocation5 + $0x158] sm:$0xff] }
 0x17f   :  { %v3909_v9 = vcombine.high %v222_v3, %v226_v4  ;;  %v3908_v17 = vcombine.low %v222_v3, %v226_v4  ;;  %v3910_v18 = vcombine.low %v223_v5, %v227_v6  ;;  %v283_v3 = vld [vmem:[#allocation5 + $0x338] sm:$0xff] }
 0x181   :  { %2614 = vmatpush1.bf16.msra.mxu0 %v4224_v10  ;;  %2737 = vmatpush1.bf16.msra.mxu1 %v4226_v11  ;;  %v3911_v10 = vcombine.high %v223_v5, %v227_v6  ;;  %v230_v11 = vld [vmem:[#allocation5 + $0x190] sm:$0xff] }
 0x182   :  { %2615 = vmatprep.subr.bf16.mxu0 %v4233_v13  ;;  %2738 = vmatprep.subr.bf16.mxu1 %v4235_v14  ;;  %v234_v13 = vld [vmem:[#allocation5 + $0x1b0] sm:$0xff]  ;;  %v231_v14 = vld [vmem:[#allocation5 + $0x198] sm:$0xff] }
 0x183   :  { %v3917_v19 = vcombine.high %v230_v11, %v234_v13  ;;  %v3916_v27 = vcombine.low %v230_v11, %v234_v13  ;;  %v3918_v28 = vcombine.low %v231_v14, %v235_v16  ;;  %v291_v11 = vld [vmem:[#allocation5 + $0x378] sm:$0xff] }
 0x185   :  { %2616 = vmatpush1.bf16.msra.mxu0 %v4232_v20  ;;  %2739 = vmatpush1.bf16.msra.mxu1 %v4234_v21  ;;  %v3919_v20 = vcombine.high %v231_v14, %v235_v16  ;;  %v238_v21 = vld [vmem:[#allocation5 + $0x1d0] sm:$0xff] }
 0x186   :  { %2617 = vmatprep.subr.bf16.mxu0 %v4241_v23  ;;  %2740 = vmatprep.subr.bf16.mxu1 %v4243_v24  ;;  %v242_v23 = vld [vmem:[#allocation5 + $0x1f0] sm:$0xff]  ;;  %v239_v24 = vld [vmem:[#allocation5 + $0x1d8] sm:$0xff] }
 0x187   :  { %v3925_v29 = vcombine.high %v238_v21, %v242_v23  ;;  %v3924_v35 = vcombine.low %v238_v21, %v242_v23  ;;  %v3926_v37 = vcombine.low %v239_v24, %v243_v26  ;;  %v299_v21 = vld [vmem:[#allocation5 + $0x3b8] sm:$0xff] }
 0x189   :  { %2618 = vmatpush1.bf16.msra.mxu0 %v4240_v30  ;;  %2741 = vmatpush1.bf16.msra.mxu1 %v4242_v31  ;;  %v3927_v30 = vcombine.high %v239_v24, %v243_v26  ;;  %v246_v31 = vld [vmem:[#allocation5 + $0x210] sm:$0xff] }
 0x18a   :  { %2751 = vmatprep.subr.bf16.mxu0 %v3869_v15  ;;  %2874 = vmatprep.subr.bf16.mxu1 %v3871_v33  ;;  %v250_v15 = vld [vmem:[#allocation5 + $0x230] sm:$0xff]  ;;  %v247_v33 = vld [vmem:[#allocation5 + $0x218] sm:$0xff] }
 0x18b   :  { %v3933_v38 = vcombine.high %v246_v31, %v250_v15  ;;  %v3932_v44 = vcombine.low %v246_v31, %v250_v15  ;;  %v3934_v45 = vcombine.low %v247_v33, %v251_v34  ;;  %v307_v31 = vld [vmem:[#allocation5 + $0x3f8] sm:$0xff] }
 0x18c   :  { %2620 = vmatmul.mubr.bf16.vlgmr.msra.gmra.mrb[0].mxu0 %v5142_v36  ;;  %2743 = vmatmul.mubr.bf16.vlgmr.msra.gmra.mrb[0].mxu1 %v5142_v36 }
 0x18d   :  { %2752 = vmatpush1.bf16.msra.mxu0 %v3868_v39  ;;  %2875 = vmatpush1.bf16.msra.mxu1 %v3870_v40  ;;  %v3935_v39 = vcombine.high %v247_v33, %v251_v34  ;;  %v254_v40 = vld [vmem:[#allocation5 + $0x250] sm:$0xff] }
 0x18e   :  { %2753 = vmatprep.subr.bf16.mxu0 %v3877_v41  ;;  %2876 = vmatprep.subr.bf16.mxu1 %v3879_v42  ;;  %v258_v41 = vld [vmem:[#allocation5 + $0x270] sm:$0xff]  ;;  %v255_v42 = vld [vmem:[#allocation5 + $0x258] sm:$0xff] }
 0x18f   :  { %2783 = vmatprep.mubr.bf16.mxu0 %v5108_v57  ;;  %2906 = vmatprep.mubr.bf16.mxu1 %v5108_v57  ;;  %v3903_v57 = vcombine.high %v215_v62, %v219_v63  ;;  %v3941_v46 = vcombine.high %v254_v40, %v258_v41  ;;  %v3940_v51 = vcombine.low %v254_v40, %v258_v41  ;;  %v315_v40 = vld [vmem:[#allocation5 + $0x438] sm:$0xff] }
 0x190   :  { %v3942_v52 = vcombine.low %v255_v42, %v259_v43 }
 0x191   :  { %2754 = vmatpush1.bf16.msra.mxu0 %v3876_v25  ;;  %2877 = vmatpush1.bf16.msra.mxu1 %v3878_v47  ;;  %v3943_v25 = vcombine.high %v255_v42, %v259_v43  ;;  %v262_v47 = vld [vmem:[#allocation5 + $0x290] sm:$0xff] }
 0x192   :  { %2755 = vmatprep.subr.bf16.mxu0 %v3885_v48  ;;  %2878 = vmatprep.subr.bf16.mxu1 %v3887_v49  ;;  %v266_v48 = vld [vmem:[#allocation5 + $0x2b0] sm:$0xff]  ;;  %v263_v49 = vld [vmem:[#allocation5 + $0x298] sm:$0xff] }
 0x193   :  { %v3949_v54 = vcombine.high %v262_v47, %v266_v48  ;;  %v3948_v61 = vcombine.low %v262_v47, %v266_v48  ;;  %v3950_v62 = vcombine.low %v263_v49, %v267_v50  ;;  %v323_v47 = vld [vmem:[#allocation5 + $0x478] sm:$0xff] }
 0x195   :  { %2756 = vmatpush1.bf16.msra.mxu0 %v3884_v55  ;;  %2879 = vmatpush1.bf16.msra.mxu1 %v3886_v56  ;;  %v3951_v55 = vcombine.high %v263_v49, %v267_v50  ;;  %v270_v56 = vld [vmem:[#allocation5 + $0x2d0] sm:$0xff] }
 0x196   :  { %2757 = vmatprep.subr.bf16.mxu0 %v3893_v58  ;;  %2880 = vmatprep.subr.bf16.mxu1 %v3895_v59  ;;  %v274_v58 = vld [vmem:[#allocation5 + $0x2f0] sm:$0xff]  ;;  %v271_v59 = vld [vmem:[#allocation5 + $0x2d8] sm:$0xff] }
 0x197   :  { %v3957_v63 = vcombine.high %v270_v56, %v274_v58  ;;  %v3956_v4 = vcombine.low %v270_v56, %v274_v58  ;;  %v3958_v5 = vcombine.low %v271_v59, %v275_v60  ;;  %v331_v56 = vld [vmem:[#allocation5 + $0x4b8] sm:$0xff] }
 0x199   :  { %2758 = vmatpush1.bf16.msra.mxu0 %v3892_v0  ;;  %2881 = vmatpush1.bf16.msra.mxu1 %v3894_v1  ;;  %v3959_v0 = vcombine.high %v271_v59, %v275_v60  ;;  %v278_v1 = vld [vmem:[#allocation5 + $0x310] sm:$0xff] }
 0x19a   :  { %2759 = vmatprep.subr.bf16.mxu0 %v3901_v2  ;;  %2882 = vmatprep.subr.bf16.mxu1 %v3903_v57  ;;  %v282_v2 = vld [vmem:[#allocation5 + $0x330] sm:$0xff]  ;;  %v279_v57 = vld [vmem:[#allocation5 + $0x318] sm:$0xff] }
 0x19b   :  { %v3965_v6 = vcombine.high %v278_v1, %v282_v2  ;;  %v3964_v13 = vcombine.low %v278_v1, %v282_v2  ;;  %v3966_v14 = vcombine.low %v279_v57, %v283_v3  ;;  %v339_v1 = vld [vmem:[#allocation5 + $0x4f8] sm:$0xff] }
 0x19d   :  { %2760 = vmatpush1.bf16.msra.mxu0 %v3900_v7  ;;  %2883 = vmatpush1.bf16.msra.mxu1 %v3902_v8  ;;  %v3967_v7 = vcombine.high %v279_v57, %v283_v3  ;;  %v286_v8 = vld [vmem:[#allocation5 + $0x350] sm:$0xff] }
 0x19e   :  { %2761 = vmatprep.subr.bf16.mxu0 %v3909_v9  ;;  %2884 = vmatprep.subr.bf16.mxu1 %v3911_v10  ;;  %v290_v9 = vld [vmem:[#allocation5 + $0x370] sm:$0xff]  ;;  %v287_v10 = vld [vmem:[#allocation5 + $0x358] sm:$0xff] }
 0x19f   :  { %v3973_v16 = vcombine.high %v286_v8, %v290_v9  ;;  %v3972_v23 = vcombine.low %v286_v8, %v290_v9  ;;  %v3974_v24 = vcombine.low %v287_v10, %v291_v11 }
 0x1a1   :  { %2762 = vmatpush1.bf16.msra.mxu0 %v3908_v17  ;;  %2885 = vmatpush1.bf16.msra.mxu1 %v3910_v18  ;;  %v3975_v17 = vcombine.high %v287_v10, %v291_v11  ;;  %v294_v18 = vld [vmem:[#allocation5 + $0x390] sm:$0xff] }
 0x1a2   :  { %2763 = vmatprep.subr.bf16.mxu0 %v3917_v19  ;;  %2886 = vmatprep.subr.bf16.mxu1 %v3919_v20  ;;  %v298_v19 = vld [vmem:[#allocation5 + $0x3b0] sm:$0xff]  ;;  %v295_v20 = vld [vmem:[#allocation5 + $0x398] sm:$0xff] }
 0x1a3   :  { %v3981_v26 = vcombine.high %v294_v18, %v298_v19  ;;  %v3980_v15 = vcombine.low %v294_v18, %v298_v19  ;;  %v3982_v33 = vcombine.low %v295_v20, %v299_v21  ;;  %v350_v11 = vld [vmem:[#allocation5 + $0x550] sm:$0xff] }
 0x1a5   :  { %2764 = vmatpush1.bf16.msra.mxu0 %v3916_v27  ;;  %2887 = vmatpush1.bf16.msra.mxu1 %v3918_v28  ;;  %v3983_v27 = vcombine.high %v295_v20, %v299_v21  ;;  %v302_v28 = vld [vmem:[#allocation5 + $0x3d0] sm:$0xff] }
 0x1a6   :  { %2765 = vmatprep.subr.bf16.mxu0 %v3925_v29  ;;  %2888 = vmatprep.subr.bf16.mxu1 %v3927_v30  ;;  %v306_v29 = vld [vmem:[#allocation5 + $0x3f0] sm:$0xff]  ;;  %v303_v30 = vld [vmem:[#allocation5 + $0x3d8] sm:$0xff] }
 0x1a7   :  { %v3989_v34 = vcombine.high %v302_v28, %v306_v29  ;;  %v3988_v41 = vcombine.low %v302_v28, %v306_v29  ;;  %v3990_v42 = vcombine.low %v303_v30, %v307_v31  ;;  %v358_v21 = vld [vmem:[#allocation5 + $0x590] sm:$0xff] }
 0x1a9   :  { %2766 = vmatpush1.bf16.msra.mxu0 %v3924_v35  ;;  %2889 = vmatpush1.bf16.msra.mxu1 %v3926_v37  ;;  %v3991_v35 = vcombine.high %v303_v30, %v307_v31  ;;  %v310_v37 = vld [vmem:[#allocation5 + $0x410] sm:$0xff] }
 0x1aa   :  { %2767 = vmatprep.subr.bf16.mxu0 %v3933_v38  ;;  %2890 = vmatprep.subr.bf16.mxu1 %v3935_v39  ;;  %v314_v38 = vld [vmem:[#allocation5 + $0x430] sm:$0xff]  ;;  %v311_v39 = vld [vmem:[#allocation5 + $0x418] sm:$0xff] }
 0x1ab   :  { %v3997_v43 = vcombine.high %v310_v37, %v314_v38  ;;  %v3996_v48 = vcombine.low %v310_v37, %v314_v38  ;;  %v3998_v49 = vcombine.low %v311_v39, %v315_v40  ;;  %v366_v31 = vld [vmem:[#allocation5 + $0x5d0] sm:$0xff] }
 0x1ad   :  { %2768 = vmatpush1.bf16.msra.mxu0 %v3932_v44  ;;  %2891 = vmatpush1.bf16.msra.mxu1 %v3934_v45  ;;  %v3999_v44 = vcombine.high %v311_v39, %v315_v40  ;;  %v318_v45 = vld [vmem:[#allocation5 + $0x450] sm:$0xff] }
 0x1ae   :  { %2769 = vmatprep.subr.bf16.mxu0 %v3941_v46  ;;  %2892 = vmatprep.subr.bf16.mxu1 %v3943_v25  ;;  %v322_v46 = vld [vmem:[#allocation5 + $0x470] sm:$0xff]  ;;  %v319_v25 = vld [vmem:[#allocation5 + $0x458] sm:$0xff] }
 0x1af   :  { %v4005_v50 = vcombine.high %v318_v45, %v322_v46  ;;  %v4004_v58 = vcombine.low %v318_v45, %v322_v46  ;;  %v4006_v59 = vcombine.low %v319_v25, %v323_v47  ;;  %v374_v40 = vld [vmem:[#allocation5 + $0x610] sm:$0xff] }
 0x1b1   :  { %2770 = vmatpush1.bf16.msra.mxu0 %v3940_v51  ;;  %2893 = vmatpush1.bf16.msra.mxu1 %v3942_v52  ;;  %v4007_v51 = vcombine.high %v319_v25, %v323_v47  ;;  %v326_v52 = vld [vmem:[#allocation5 + $0x490] sm:$0xff] }
 0x1b2   :  { %2771 = vmatprep.subr.bf16.mxu0 %v3949_v54  ;;  %2894 = vmatprep.subr.bf16.mxu1 %v3951_v55  ;;  %v330_v54 = vld [vmem:[#allocation5 + $0x4b0] sm:$0xff]  ;;  %v327_v55 = vld [vmem:[#allocation5 + $0x498] sm:$0xff] }
 0x1b3   :  { %v4013_v60 = vcombine.high %v326_v52, %v330_v54  ;;  %v4012_v2 = vcombine.low %v326_v52, %v330_v54  ;;  %v382_v47 = vld [vmem:[#allocation5 + $0x650] sm:$0xff] }
 0x1b5   :  { %2772 = vmatpush1.bf16.msra.mxu0 %v3948_v61  ;;  %2895 = vmatpush1.bf16.msra.mxu1 %v3950_v62  ;;  %v4015_v61 = vcombine.high %v327_v55, %v331_v56  ;;  %v334_v62 = vld [vmem:[#allocation5 + $0x4d0] sm:$0xff] }
 0x1b6   :  { %2773 = vmatprep.subr.bf16.mxu0 %v3957_v63  ;;  %2896 = vmatprep.subr.bf16.mxu1 %v3959_v0  ;;  %v338_v63 = vld [vmem:[#allocation5 + $0x4f0] sm:$0xff]  ;;  %v335_v0 = vld [vmem:[#allocation5 + $0x4d8] sm:$0xff] }
 0x1b7   :  { %v4021_v57 = vcombine.high %v334_v62, %v338_v63  ;;  %v4023_v3 = vcombine.high %v335_v0, %v339_v1  ;;  %v4020_v8 = vcombine.low %v334_v62, %v338_v63  ;;  %v4022_v9 = vcombine.low %v335_v0, %v339_v1  ;;  %v398_v1 = vld [vmem:[#allocation5 + $0x6d0] sm:$0xff] }
 0x1b9   :  { %2774 = vmatpush1.bf16.msra.mxu0 %v3956_v4  ;;  %2897 = vmatpush1.bf16.msra.mxu1 %v3958_v5  ;;  %v342_v4 = vld [vmem:[#allocation5 + $0x510] sm:$0xff] }
 0x1ba   :  { %2775 = vmatprep.subr.bf16.mxu0 %v3965_v6  ;;  %2898 = vmatprep.subr.bf16.mxu1 %v3967_v7  ;;  %v346_v5 = vld [vmem:[#allocation5 + $0x530] sm:$0xff]  ;;  %v343_v6 = vld [vmem:[#allocation5 + $0x518] sm:$0xff] }
 0x1bb   :  { %v347_v7 = vld [vmem:[#allocation5 + $0x538] sm:$0xff]  ;;  %v4029_v10 = vcombine.high %v342_v4, %v346_v5 }
 0x1bc   :  { %v4030_v18 = vcombine.low %v343_v6, %v347_v7 }
 0x1bd   :  { %2776 = vmatpush1.bf16.msra.mxu0 %v3964_v13  ;;  %2899 = vmatpush1.bf16.msra.mxu1 %v3966_v14  ;;  %v354_v13 = vld [vmem:[#allocation5 + $0x570] sm:$0xff]  ;;  %v351_v14 = vld [vmem:[#allocation5 + $0x558] sm:$0xff] }
 0x1be   :  { %2777 = vmatprep.subr.bf16.mxu0 %v3973_v16  ;;  %2900 = vmatprep.subr.bf16.mxu1 %v3975_v17  ;;  %v355_v16 = vld [vmem:[#allocation5 + $0x578] sm:$0xff]  ;;  %v4028_v17 = vcombine.low %v342_v4, %v346_v5  ;;  %v4037_v19 = vcombine.high %v350_v11, %v354_v13 }
 0x1bf   :  { %v4039_v20 = vcombine.high %v351_v14, %v355_v16  ;;  %v4038_v28 = vcombine.low %v351_v14, %v355_v16  ;;  %v414_v16 = vld [vmem:[#allocation5 + $0x750] sm:$0xff] }
 0x1c1   :  { %2778 = vmatpush1.bf16.msra.mxu0 %v3972_v23  ;;  %2901 = vmatpush1.bf16.msra.mxu1 %v3974_v24  ;;  %v362_v23 = vld [vmem:[#allocation5 + $0x5b0] sm:$0xff]  ;;  %v359_v24 = vld [vmem:[#allocation5 + $0x598] sm:$0xff] }
 0x1c2   :  { %2779 = vmatprep.subr.bf16.mxu0 %v3981_v26  ;;  %2902 = vmatprep.subr.bf16.mxu1 %v3983_v27  ;;  %v363_v26 = vld [vmem:[#allocation5 + $0x5b8] sm:$0xff]  ;;  %v4036_v27 = vcombine.low %v350_v11, %v354_v13  ;;  %v4045_v29 = vcombine.high %v358_v21, %v362_v23 }
 0x1c3   :  { %v4047_v30 = vcombine.high %v359_v24, %v363_v26  ;;  %v4046_v37 = vcombine.low %v359_v24, %v363_v26  ;;  %v422_v26 = vld [vmem:[#allocation5 + $0x790] sm:$0xff] }
 0x1c5   :  { %2780 = vmatpush1.bf16.msra.mxu0 %v3980_v15  ;;  %2903 = vmatpush1.bf16.msra.mxu1 %v3982_v33  ;;  %v370_v15 = vld [vmem:[#allocation5 + $0x5f0] sm:$0xff]  ;;  %v367_v33 = vld [vmem:[#allocation5 + $0x5d8] sm:$0xff] }
 0x1c6   :  { %2781 = vmatprep.subr.bf16.mxu0 %v3989_v34  ;;  %2904 = vmatprep.subr.bf16.mxu1 %v3991_v35  ;;  %v371_v34 = vld [vmem:[#allocation5 + $0x5f8] sm:$0xff]  ;;  %v4044_v35 = vcombine.low %v358_v21, %v362_v23  ;;  %v4053_v38 = vcombine.high %v366_v31, %v370_v15 }
 0x1c7   :  { %v4055_v39 = vcombine.high %v367_v33, %v371_v34  ;;  %v4054_v45 = vcombine.low %v367_v33, %v371_v34  ;;  %v430_v34 = vld [vmem:[#allocation5 + $0x7d0] sm:$0xff] }
 0x1c9   :  { %2782 = vmatpush1.bf16.msra.mxu0 %v3988_v41  ;;  %2905 = vmatpush1.bf16.msra.mxu1 %v3990_v42  ;;  %v378_v41 = vld [vmem:[#allocation5 + $0x630] sm:$0xff]  ;;  %v375_v42 = vld [vmem:[#allocation5 + $0x618] sm:$0xff] }
 0x1ca   :  { %2792 = vmatprep.subr.bf16.mxu0 %v3997_v43  ;;  %2915 = vmatprep.subr.bf16.mxu1 %v3999_v44  ;;  %v379_v43 = vld [vmem:[#allocation5 + $0x638] sm:$0xff]  ;;  %v4052_v44 = vcombine.low %v366_v31, %v370_v15  ;;  %v4061_v46 = vcombine.high %v374_v40, %v378_v41 }
 0x1cb   :  { %v4063_v25 = vcombine.high %v375_v42, %v379_v43  ;;  %v4062_v52 = vcombine.low %v375_v42, %v379_v43  ;;  %v438_v43 = vld [vmem:[#allocation5 + $0x810] sm:$0xff] }
 0x1cc   :  { %2784 = vmatmul.mubr.bf16.vlgmr.msra.gmra.mrb[4].mxu0 %v5114_v12  ;;  %2907 = vmatmul.mubr.bf16.vlgmr.msra.gmra.mrb[4].mxu1 %v5114_v12  ;;  %v4014_v12 = vcombine.low %v327_v55, %v331_v56  ;;  %v390_v56 = vld [vmem:[#allocation5 + $0x690] sm:$0xff] }
 0x1cd   :  { %2793 = vmatpush1.bf16.msra.mxu0 %v3996_v48  ;;  %2916 = vmatpush1.bf16.msra.mxu1 %v3998_v49  ;;  %v386_v48 = vld [vmem:[#allocation5 + $0x670] sm:$0xff]  ;;  %v383_v49 = vld [vmem:[#allocation5 + $0x658] sm:$0xff] }
 0x1ce   :  { %2794 = vmatprep.subr.bf16.mxu0 %v4005_v50  ;;  %2917 = vmatprep.subr.bf16.mxu1 %v4007_v51  ;;  %v387_v50 = vld [vmem:[#allocation5 + $0x678] sm:$0xff]  ;;  %v4060_v51 = vcombine.low %v374_v40, %v378_v41  ;;  %v4069_v54 = vcombine.high %v382_v47, %v386_v48 }
 0x1cf   :  { %2824 = vmatprep.mubr.bf16.mxu0 %v5120_v53  ;;  %2947 = vmatprep.mubr.bf16.mxu1 %v5120_v53  ;;  %v4031_v53 = vcombine.high %v343_v6, %v347_v7  ;;  %v4071_v55 = vcombine.high %v383_v49, %v387_v50  ;;  %v4070_v62 = vcombine.low %v383_v49, %v387_v50  ;;  %v406_v7 = vld [vmem:[#allocation5 + $0x710] sm:$0xff] }
 0x1d0   :  { %v446_v50 = vld [vmem:[#allocation5 + $0x850] sm:$0xff] }
 0x1d1   :  { %2795 = vmatpush1.bf16.msra.mxu0 %v4004_v58  ;;  %2918 = vmatpush1.bf16.msra.mxu1 %v4006_v59  ;;  %v394_v58 = vld [vmem:[#allocation5 + $0x6b0] sm:$0xff]  ;;  %v391_v59 = vld [vmem:[#allocation5 + $0x698] sm:$0xff] }
 0x1d2   :  { %2796 = vmatprep.subr.bf16.mxu0 %v4013_v60  ;;  %2919 = vmatprep.subr.bf16.mxu1 %v4015_v61  ;;  %v395_v60 = vld [vmem:[#allocation5 + $0x6b8] sm:$0xff]  ;;  %v4068_v61 = vcombine.low %v382_v47, %v386_v48  ;;  %v4077_v63 = vcombine.high %v390_v56, %v394_v58 }
 0x1d3   :  { %v4079_v0 = vcombine.high %v391_v59, %v395_v60  ;;  %v4078_v4 = vcombine.low %v391_v59, %v395_v60  ;;  %v454_v60 = vld [vmem:[#allocation5 + $0x890] sm:$0xff] }
 0x1d5   :  { %2797 = vmatpush1.bf16.msra.mxu0 %v4012_v2  ;;  %2920 = vmatpush1.bf16.msra.mxu1 %v4014_v12  ;;  %v402_v2 = vld [vmem:[#allocation5 + $0x6f0] sm:$0xff]  ;;  %v399_v12 = vld [vmem:[#allocation5 + $0x6d8] sm:$0xff] }
 0x1d6   :  { %2798 = vmatprep.subr.bf16.mxu0 %v4021_v57  ;;  %2921 = vmatprep.subr.bf16.mxu1 %v4023_v3  ;;  %v403_v57 = vld [vmem:[#allocation5 + $0x6f8] sm:$0xff]  ;;  %v4076_v3 = vcombine.low %v390_v56, %v394_v58  ;;  %v4085_v5 = vcombine.high %v398_v1, %v402_v2 }
 0x1d7   :  { %v4087_v6 = vcombine.high %v399_v12, %v403_v57  ;;  %v4086_v11 = vcombine.low %v399_v12, %v403_v57  ;;  %v462_v57 = vld [vmem:[#allocation5 + $0x8d0] sm:$0xff] }
 0x1d9   :  { %2799 = vmatpush1.bf16.msra.mxu0 %v4020_v8  ;;  %2922 = vmatpush1.bf16.msra.mxu1 %v4022_v9  ;;  %v410_v8 = vld [vmem:[#allocation5 + $0x730] sm:$0xff]  ;;  %v407_v9 = vld [vmem:[#allocation5 + $0x718] sm:$0xff] }
 0x1da   :  { %2800 = vmatprep.subr.bf16.mxu0 %v4029_v10  ;;  %2923 = vmatprep.subr.bf16.mxu1 %v4031_v53  ;;  %v411_v10 = vld [vmem:[#allocation5 + $0x738] sm:$0xff]  ;;  %v4084_v53 = vcombine.low %v398_v1, %v402_v2  ;;  %v4093_v13 = vcombine.high %v406_v7, %v410_v8 }
 0x1db   :  { %v4095_v14 = vcombine.high %v407_v9, %v411_v10  ;;  %v4094_v21 = vcombine.low %v407_v9, %v411_v10  ;;  %v470_v9 = vld [vmem:[#allocation5 + $0x910] sm:$0xff] }
 0x1dc   :  { %v474_v10 = vld [vmem:[#allocation5 + $0x930] sm:$0xff] }
 0x1dd   :  { %2801 = vmatpush1.bf16.msra.mxu0 %v4028_v17  ;;  %2924 = vmatpush1.bf16.msra.mxu1 %v4030_v18  ;;  %v418_v17 = vld [vmem:[#allocation5 + $0x770] sm:$0xff]  ;;  %v415_v18 = vld [vmem:[#allocation5 + $0x758] sm:$0xff] }
 0x1de   :  { %2802 = vmatprep.subr.bf16.mxu0 %v4037_v19  ;;  %2925 = vmatprep.subr.bf16.mxu1 %v4039_v20  ;;  %v419_v19 = vld [vmem:[#allocation5 + $0x778] sm:$0xff]  ;;  %v4092_v20 = vcombine.low %v406_v7, %v410_v8  ;;  %v4101_v23 = vcombine.high %v414_v16, %v418_v17 }
 0x1df   :  { %v4103_v24 = vcombine.high %v415_v18, %v419_v19  ;;  %v4102_v31 = vcombine.low %v415_v18, %v419_v19  ;;  %v482_v18 = vld [vmem:[#allocation5 + $0x970] sm:$0xff]  ;;  %v479_v19 = vld [vmem:[#allocation5 + $0x958] sm:$0xff] }
 0x1e1   :  { %2803 = vmatpush1.bf16.msra.mxu0 %v4036_v27  ;;  %2926 = vmatpush1.bf16.msra.mxu1 %v4038_v28  ;;  %v426_v27 = vld [vmem:[#allocation5 + $0x7b0] sm:$0xff]  ;;  %v423_v28 = vld [vmem:[#allocation5 + $0x798] sm:$0xff] }
 0x1e2   :  { %2804 = vmatprep.subr.bf16.mxu0 %v4045_v29  ;;  %2927 = vmatprep.subr.bf16.mxu1 %v4047_v30  ;;  %v427_v29 = vld [vmem:[#allocation5 + $0x7b8] sm:$0xff]  ;;  %v4100_v30 = vcombine.low %v414_v16, %v418_v17  ;;  %v4109_v15 = vcombine.high %v422_v26, %v426_v27  ;;  %v4157_v16 = vcombine.high %v470_v9, %v474_v10  ;;  %v478_v17 = vld [vmem:[#allocation5 + $0x950] sm:$0xff] }
 0x1e3   :  { %v4111_v33 = vcombine.high %v423_v28, %v427_v29  ;;  %v4110_v40 = vcombine.low %v423_v28, %v427_v29  ;;  %v490_v28 = vld [vmem:[#allocation5 + $0x9b0] sm:$0xff]  ;;  %v487_v29 = vld [vmem:[#allocation5 + $0x998] sm:$0xff] }
 0x1e5   :  { %2805 = vmatpush1.bf16.msra.mxu0 %v4044_v35  ;;  %2928 = vmatpush1.bf16.msra.mxu1 %v4046_v37  ;;  %v434_v35 = vld [vmem:[#allocation5 + $0x7f0] sm:$0xff]  ;;  %v431_v37 = vld [vmem:[#allocation5 + $0x7d8] sm:$0xff] }
 0x1e6   :  { %2806 = vmatprep.subr.bf16.mxu0 %v4053_v38  ;;  %2929 = vmatprep.subr.bf16.mxu1 %v4055_v39  ;;  %v435_v38 = vld [vmem:[#allocation5 + $0x7f8] sm:$0xff]  ;;  %v4108_v39 = vcombine.low %v422_v26, %v426_v27  ;;  %v4117_v41 = vcombine.high %v430_v34, %v434_v35  ;;  %v486_v27 = vld [vmem:[#allocation5 + $0x990] sm:$0xff] }
 0x1e7   :  { %v4119_v42 = vcombine.high %v431_v37, %v435_v38  ;;  %v4118_v47 = vcombine.low %v431_v37, %v435_v38  ;;  %v498_v37 = vld [vmem:[#allocation5 + $0x9f0] sm:$0xff]  ;;  %v495_v38 = vld [vmem:[#allocation5 + $0x9d8] sm:$0xff] }
 0x1e9   :  { %2807 = vmatpush1.bf16.msra.mxu0 %v4052_v44  ;;  %2930 = vmatpush1.bf16.msra.mxu1 %v4054_v45  ;;  %v442_v44 = vld [vmem:[#allocation5 + $0x830] sm:$0xff]  ;;  %v439_v45 = vld [vmem:[#allocation5 + $0x818] sm:$0xff] }
 0x1ea   :  { %2808 = vmatprep.subr.bf16.mxu0 %v4061_v46  ;;  %2931 = vmatprep.subr.bf16.mxu1 %v4063_v25  ;;  %v443_v46 = vld [vmem:[#allocation5 + $0x838] sm:$0xff]  ;;  %v4116_v25 = vcombine.low %v430_v34, %v434_v35  ;;  %v4125_v48 = vcombine.high %v438_v43, %v442_v44  ;;  %v494_v35 = vld [vmem:[#allocation5 + $0x9d0] sm:$0xff] }
 0x1eb   :  { %v4127_v49 = vcombine.high %v439_v45, %v443_v46  ;;  %v4126_v56 = vcombine.low %v439_v45, %v443_v46  ;;  %v506_v45 = vld [vmem:[#allocation5 + $0xa30] sm:$0xff]  ;;  %v503_v46 = vld [vmem:[#allocation5 + $0xa18] sm:$0xff] }
 0x1ed   :  { %2809 = vmatpush1.bf16.msra.mxu0 %v4060_v51  ;;  %2932 = vmatpush1.bf16.msra.mxu1 %v4062_v52  ;;  %v450_v51 = vld [vmem:[#allocation5 + $0x870] sm:$0xff]  ;;  %v447_v52 = vld [vmem:[#allocation5 + $0x858] sm:$0xff] }
 0x1ee   :  { %2810 = vmatprep.subr.bf16.mxu0 %v4069_v54  ;;  %2933 = vmatprep.subr.bf16.mxu1 %v4071_v55  ;;  %v451_v54 = vld [vmem:[#allocation5 + $0x878] sm:$0xff]  ;;  %v4124_v55 = vcombine.low %v438_v43, %v442_v44  ;;  %v4133_v58 = vcombine.high %v446_v50, %v450_v51  ;;  %v502_v44 = vld [vmem:[#allocation5 + $0xa10] sm:$0xff] }
 0x1ef   :  { %v4135_v59 = vcombine.high %v447_v52, %v451_v54  ;;  %v4134_v1 = vcombine.low %v447_v52, %v451_v54  ;;  %v514_v52 = vld [vmem:[#allocation5 + $0xa70] sm:$0xff]  ;;  %v511_v54 = vld [vmem:[#allocation5 + $0xa58] sm:$0xff] }
 0x1f1   :  { %2811 = vmatpush1.bf16.msra.mxu0 %v4068_v61  ;;  %2934 = vmatpush1.bf16.msra.mxu1 %v4070_v62  ;;  %v458_v61 = vld [vmem:[#allocation5 + $0x8b0] sm:$0xff]  ;;  %v455_v62 = vld [vmem:[#allocation5 + $0x898] sm:$0xff] }
 0x1f2   :  { %2812 = vmatprep.subr.bf16.mxu0 %v4077_v63  ;;  %2935 = vmatprep.subr.bf16.mxu1 %v4079_v0  ;;  %v459_v63 = vld [vmem:[#allocation5 + $0x8b8] sm:$0xff]  ;;  %v4132_v0 = vcombine.low %v446_v50, %v450_v51  ;;  %v4141_v2 = vcombine.high %v454_v60, %v458_v61  ;;  %v510_v51 = vld [vmem:[#allocation5 + $0xa50] sm:$0xff] }
 0x1f3   :  { %v4143_v12 = vcombine.high %v455_v62, %v459_v63 }
 0x1f5   :  { %2813 = vmatpush1.bf16.msra.mxu0 %v4076_v3  ;;  %2936 = vmatpush1.bf16.msra.mxu1 %v4078_v4  ;;  %v466_v3 = vld [vmem:[#allocation5 + $0x8f0] sm:$0xff]  ;;  %v463_v4 = vld [vmem:[#allocation5 + $0x8d8] sm:$0xff] }
 0x1f6   :  { %2814 = vmatprep.subr.bf16.mxu0 %v4085_v5  ;;  %2937 = vmatprep.subr.bf16.mxu1 %v4087_v6  ;;  %v467_v5 = vld [vmem:[#allocation5 + $0x8f8] sm:$0xff]  ;;  %v4140_v6 = vcombine.low %v454_v60, %v458_v61  ;;  %v4149_v7 = vcombine.high %v462_v57, %v466_v3  ;;  %v518_v61 = vld [vmem:[#allocation5 + $0xa90] sm:$0xff] }
 0x1f7   :  { %v4151_v8 = vcombine.high %v463_v4, %v467_v5 }
 0x1f9   :  { %2815 = vmatpush1.bf16.msra.mxu0 %v4084_v53  ;;  %2938 = vmatpush1.bf16.msra.mxu1 %v4086_v11  ;;  %v471_v53 = vld [vmem:[#allocation5 + $0x918] sm:$0xff] }
 0x1fa   :  { %2816 = vmatprep.subr.bf16.mxu0 %v4093_v13  ;;  %2939 = vmatprep.subr.bf16.mxu1 %v4095_v14  ;;  %v475_v11 = vld [vmem:[#allocation5 + $0x938] sm:$0xff]  ;;  %v4148_v13 = vcombine.low %v462_v57, %v466_v3  ;;  %v4150_v14 = vcombine.low %v463_v4, %v467_v5  ;;  %v526_v3 = vld [vmem:[#allocation5 + $0xad0] sm:$0xff] }
 0x1fb   :  { %v530_v4 = vld [vmem:[#allocation5 + $0xaf0] sm:$0xff]  ;;  %v527_v5 = vld [vmem:[#allocation5 + $0xad8] sm:$0xff] }
 0x1fd   :  { %2817 = vmatpush1.bf16.msra.mxu0 %v4092_v20  ;;  %2940 = vmatpush1.bf16.msra.mxu1 %v4094_v21  ;;  %v483_v20 = vld [vmem:[#allocation5 + $0x978] sm:$0xff]  ;;  %v4156_v21 = vcombine.low %v470_v9, %v474_v10  ;;  %v534_v10 = vld [vmem:[#allocation5 + $0xb10] sm:$0xff] }
 0x1fe   :  { %2818 = vmatprep.subr.bf16.mxu0 %v4101_v23  ;;  %2941 = vmatprep.subr.bf16.mxu1 %v4103_v24  ;;  %v4158_v23 = vcombine.low %v471_v53, %v475_v11  ;;  %v4165_v24 = vcombine.high %v478_v17, %v482_v18  ;;  %v4167_v26 = vcombine.high %v479_v19, %v483_v20 }
 0x201   :  { %2819 = vmatpush1.bf16.msra.mxu0 %v4100_v30  ;;  %2942 = vmatpush1.bf16.msra.mxu1 %v4102_v31  ;;  %v491_v30 = vld [vmem:[#allocation5 + $0x9b8] sm:$0xff]  ;;  %v4164_v31 = vcombine.low %v478_v17, %v482_v18  ;;  %v542_v18 = vld [vmem:[#allocation5 + $0xb50] sm:$0xff] }
 0x202   :  { %2820 = vmatprep.subr.bf16.mxu0 %v4109_v15  ;;  %2943 = vmatprep.subr.bf16.mxu1 %v4111_v33  ;;  %v4166_v15 = vcombine.low %v479_v19, %v483_v20  ;;  %v4173_v33 = vcombine.high %v486_v27, %v490_v28  ;;  %v4175_v34 = vcombine.high %v487_v29, %v491_v30  ;;  %v546_v19 = vld [vmem:[#allocation5 + $0xb70] sm:$0xff]  ;;  %v543_v20 = vld [vmem:[#allocation5 + $0xb58] sm:$0xff] }
 0x205   :  { %2821 = vmatpush1.bf16.msra.mxu0 %v4108_v39  ;;  %2944 = vmatpush1.bf16.msra.mxu1 %v4110_v40  ;;  %v499_v39 = vld [vmem:[#allocation5 + $0x9f8] sm:$0xff]  ;;  %v4172_v40 = vcombine.low %v486_v27, %v490_v28  ;;  %v550_v28 = vld [vmem:[#allocation5 + $0xb90] sm:$0xff] }
 0x206   :  { %2822 = vmatprep.subr.bf16.mxu0 %v4117_v41  ;;  %2945 = vmatprep.subr.bf16.mxu1 %v4119_v42  ;;  %v4174_v41 = vcombine.low %v487_v29, %v491_v30  ;;  %v4181_v42 = vcombine.high %v494_v35, %v498_v37  ;;  %v4183_v43 = vcombine.high %v495_v38, %v499_v39  ;;  %v554_v29 = vld [vmem:[#allocation5 + $0xbb0] sm:$0xff]  ;;  %v551_v30 = vld [vmem:[#allocation5 + $0xb98] sm:$0xff] }
 0x209   :  { %2823 = vmatpush1.bf16.msra.mxu0 %v4116_v25  ;;  %2946 = vmatpush1.bf16.msra.mxu1 %v4118_v47  ;;  %v507_v25 = vld [vmem:[#allocation5 + $0xa38] sm:$0xff]  ;;  %v4180_v47 = vcombine.low %v494_v35, %v498_v37  ;;  %v558_v37 = vld [vmem:[#allocation5 + $0xbd0] sm:$0xff] }
 0x20a   :  { %2833 = vmatprep.subr.bf16.mxu0 %v4125_v48  ;;  %2956 = vmatprep.subr.bf16.mxu1 %v4127_v49  ;;  %v4182_v48 = vcombine.low %v495_v38, %v499_v39  ;;  %v4189_v49 = vcombine.high %v502_v44, %v506_v45  ;;  %v4191_v50 = vcombine.high %v503_v46, %v507_v25  ;;  %v562_v38 = vld [vmem:[#allocation5 + $0xbf0] sm:$0xff]  ;;  %v559_v39 = vld [vmem:[#allocation5 + $0xbd8] sm:$0xff] }
 0x20c   :  { %2825 = vmatmul.mubr.bf16.vlgmr.msra.gmra.mrb[4].mxu0 %v5128_v22  ;;  %2948 = vmatmul.mubr.bf16.vlgmr.msra.gmra.mrb[4].mxu1 %v5128_v22  ;;  %v4142_v22 = vcombine.low %v455_v62, %v459_v63  ;;  %v522_v62 = vld [vmem:[#allocation5 + $0xab0] sm:$0xff]  ;;  %v519_v63 = vld [vmem:[#allocation5 + $0xa98] sm:$0xff] }
 0x20d   :  { %2834 = vmatpush1.bf16.msra.mxu0 %v4124_v55  ;;  %2957 = vmatpush1.bf16.msra.mxu1 %v4126_v56  ;;  %v515_v55 = vld [vmem:[#allocation5 + $0xa78] sm:$0xff]  ;;  %v4188_v56 = vcombine.low %v502_v44, %v506_v45  ;;  %v4244_v45 = vcombine.low %v558_v37, %v562_v38 }
 0x20e   :  { %2835 = vmatprep.subr.bf16.mxu0 %v4133_v58  ;;  %2958 = vmatprep.subr.bf16.mxu1 %v4135_v59  ;;  %v4190_v58 = vcombine.low %v503_v46, %v507_v25  ;;  %v4197_v59 = vcombine.high %v510_v51, %v514_v52  ;;  %v4199_v60 = vcombine.high %v511_v54, %v515_v55  ;;  %v4487_v25 = vld [vmem:[#allocation8 + $0x4] ss:$16 sps:$4 sm:$0xff]  }
 0x20f   :  { %2865 = vmatprep.mubr.bf16.mxu0 %v5134_v32  ;;  %2988 = vmatprep.mubr.bf16.mxu1 %v5134_v32  ;;  %v4159_v32 = vcombine.high %v471_v53, %v475_v11  ;;  %v538_v53 = vld [vmem:[#allocation5 + $0xb30] sm:$0xff]  ;;  %v535_v11 = vld [vmem:[#allocation5 + $0xb18] sm:$0xff] }
 0x211   :  { %2836 = vmatpush1.bf16.msra.mxu0 %v4132_v0  ;;  %2959 = vmatpush1.bf16.msra.mxu1 %v4134_v1  ;;  %v523_v0 = vld [vmem:[#allocation5 + $0xab8] sm:$0xff]  ;;  %v4196_v1 = vcombine.low %v510_v51, %v514_v52  ;;  %v4491_v52 = vld [vmem:[#allocation8 + $0x20] ss:$16 sps:$4 sm:$0xff]  }
 0x212   :  { %2837 = vmatprep.subr.bf16.mxu0 %v4141_v2  ;;  %2960 = vmatprep.subr.bf16.mxu1 %v4143_v12  ;;  %v4198_v2 = vcombine.low %v511_v54, %v515_v55  ;;  %v4205_v12 = vcombine.high %v518_v61, %v522_v62  ;;  %v4207_v57 = vcombine.high %v519_v63, %v523_v0  ;;  %v4496_v51 = vld [vmem:[#allocation8 + $0x2c] ss:$16 sps:$4 sm:$0xff]   ;;  %v4494_v54 = vld [vmem:[#allocation8 + $0x28] ss:$16 sps:$4 sm:$0xff]   ;;  %v4499_v55 = vld [vmem:[#allocation8 + $0x44] ss:$16 sps:$4 sm:$0xff]  }
 0x215   :  { %2838 = vmatpush1.bf16.msra.mxu0 %v4140_v6  ;;  %2961 = vmatpush1.bf16.msra.mxu1 %v4142_v22  ;;  %v531_v6 = vld [vmem:[#allocation5 + $0xaf8] sm:$0xff]  ;;  %v4204_v22 = vcombine.low %v518_v61, %v522_v62  ;;  %v4503_v62 = vld [vmem:[#allocation8 + $0x60] ss:$16 sps:$4 sm:$0xff]  }
 0x216   :  { %2839 = vmatprep.subr.bf16.mxu0 %v4149_v7  ;;  %2962 = vmatprep.subr.bf16.mxu1 %v4151_v8  ;;  %v4206_v7 = vcombine.low %v519_v63, %v523_v0  ;;  %v4213_v8 = vcombine.high %v526_v3, %v530_v4  ;;  %v4215_v9 = vcombine.high %v527_v5, %v531_v6  ;;  %v4508_v61 = vld [vmem:[#allocation8 + $0x6c] ss:$16 sps:$4 sm:$0xff]   ;;  %v4511_v63 = vld [vmem:[#allocation8 + $0x84] ss:$16 sps:$4 sm:$0xff]  }
 0x217   :  { %v4514_v0 = vld [vmem:[#allocation8 + $0x8c] ss:$16 sps:$4 sm:$0xff]  }
 0x219   :  { %2840 = vmatpush1.bf16.msra.mxu0 %v4148_v13  ;;  %2963 = vmatpush1.bf16.msra.mxu1 %v4150_v14  ;;  %v539_v13 = vld [vmem:[#allocation5 + $0xb38] sm:$0xff]  ;;  %v4212_v14 = vcombine.low %v526_v3, %v530_v4  ;;  %v4515_v3 = vld [vmem:[#allocation8 + $0xa0] ss:$16 sps:$4 sm:$0xff]  }
 0x21a   :  { %2841 = vmatprep.subr.bf16.mxu0 %v4157_v16  ;;  %2964 = vmatprep.subr.bf16.mxu1 %v4159_v32  ;;  %v4214_v16 = vcombine.low %v527_v5, %v531_v6  ;;  %v4221_v32 = vcombine.high %v534_v10, %v538_v53  ;;  %v4223_v17 = vcombine.high %v535_v11, %v539_v13  ;;  %v4518_v4 = vld [vmem:[#allocation8 + $0xa8] ss:$16 sps:$4 sm:$0xff]   ;;  %v4523_v5 = vld [vmem:[#allocation8 + $0xc4] ss:$16 sps:$4 sm:$0xff]  }
 0x21d   :  { %2842 = vmatpush1.bf16.msra.mxu0 %v4156_v21  ;;  %2965 = vmatpush1.bf16.msra.mxu1 %v4158_v23  ;;  %v547_v21 = vld [vmem:[#allocation5 + $0xb78] sm:$0xff]  ;;  %v4220_v23 = vcombine.low %v534_v10, %v538_v53 }
 0x21e   :  { %2843 = vmatprep.subr.bf16.mxu0 %v4165_v24  ;;  %2966 = vmatprep.subr.bf16.mxu1 %v4167_v26  ;;  %v4222_v24 = vcombine.low %v535_v11, %v539_v13  ;;  %v4229_v26 = vcombine.high %v542_v18, %v546_v19  ;;  %v4231_v27 = vcombine.high %v543_v20, %v547_v21  ;;  %v4521_v11 = vld [vmem:[#allocation8 + $0xc0] ss:$16 sps:$4 sm:$0xff]  }
 0x221   :  { %2844 = vmatpush1.bf16.msra.mxu0 %v4164_v31  ;;  %2967 = vmatpush1.bf16.msra.mxu1 %v4166_v15  ;;  %v555_v31 = vld [vmem:[#allocation5 + $0xbb8] sm:$0xff]  ;;  %v4228_v15 = vcombine.low %v542_v18, %v546_v19 }
 0x222   :  { %2845 = vmatprep.subr.bf16.mxu0 %v4173_v33  ;;  %2968 = vmatprep.subr.bf16.mxu1 %v4175_v34  ;;  %v4230_v33 = vcombine.low %v543_v20, %v547_v21  ;;  %v4237_v34 = vcombine.high %v550_v28, %v554_v29  ;;  %v4239_v35 = vcombine.high %v551_v30, %v555_v31  ;;  %v4532_v19 = vld [vmem:[#allocation8 + $0xec] ss:$16 sps:$4 sm:$0xff]   ;;  %v4527_v20 = vld [vmem:[#allocation8 + $0xe0] ss:$16 sps:$4 sm:$0xff]   ;;  %v4530_v21 = vld [vmem:[#allocation8 + $0xe8] ss:$16 sps:$4 sm:$0xff]  }
 0x225   :  { %2846 = vmatpush1.bf16.msra.mxu0 %v4172_v40  ;;  %2969 = vmatpush1.bf16.msra.mxu1 %v4174_v41  ;;  %v563_v40 = vld [vmem:[#allocation5 + $0xbf8] sm:$0xff]  ;;  %v4236_v41 = vcombine.low %v550_v28, %v554_v29 }
 0x226   :  { %2847 = vmatprep.subr.bf16.mxu0 %v4181_v42  ;;  %2970 = vmatprep.subr.bf16.mxu1 %v4183_v43  ;;  %v4238_v42 = vcombine.low %v551_v30, %v555_v31  ;;  %v4245_v43 = vcombine.high %v558_v37, %v562_v38  ;;  %v4247_v44 = vcombine.high %v559_v39, %v563_v40  ;;  %v4541_v28 = vld [vmem:[#allocation8 + $0x124] ss:$16 sps:$4 sm:$0xff]   ;;  %v4544_v29 = vld [vmem:[#allocation8 + $0x12c] ss:$16 sps:$4 sm:$0xff]   ;;  %v4539_v30 = vld [vmem:[#allocation8 + $0x120] ss:$16 sps:$4 sm:$0xff]  }
 0x227   :  { %v4246_v46 = vcombine.low %v559_v39, %v563_v40  ;;  %v4542_v31 = vld [vmem:[#allocation8 + $0x128] ss:$16 sps:$4 sm:$0xff]   ;;  %v4553_v37 = vld [vmem:[#allocation8 + $0x164] ss:$16 sps:$4 sm:$0xff]   ;;  %v4556_v38 = vld [vmem:[#allocation8 + $0x16c] ss:$16 sps:$4 sm:$0xff]  }
 0x228   :  { %v4551_v39 = vld [vmem:[#allocation8 + $0x160] ss:$16 sps:$4 sm:$0xff]   ;;  %v4554_v40 = vld [vmem:[#allocation8 + $0x168] ss:$16 sps:$4 sm:$0xff]  }
 0x229   :  { %2848 = vmatpush1.bf16.msra.mxu0 %v4180_v47  ;;  %2971 = vmatpush1.bf16.msra.mxu1 %v4182_v48  ;;  %v4490_v47 = vld [vmem:[#allocation8 + $0xc] ss:$16 sps:$4 sm:$0xff]   ;;  %v4485_v48 = vld [vmem:[#allocation8] ss:$16 sps:$4 sm:$0xff]  }
 0x22a   :  { %2849 = vmatprep.subr.bf16.mxu0 %v4189_v49  ;;  %2972 = vmatprep.subr.bf16.mxu1 %v4191_v50  ;;  %v4488_v49 = vld [vmem:[#allocation8 + $0x8] ss:$16 sps:$4 sm:$0xff]   ;;  %v4493_v50 = vld [vmem:[#allocation8 + $0x24] ss:$16 sps:$4 sm:$0xff]  }
 0x22d   :  { %2850 = vmatpush1.bf16.msra.mxu0 %v4188_v56  ;;  %2973 = vmatpush1.bf16.msra.mxu1 %v4190_v58  ;;  %v4502_v56 = vld [vmem:[#allocation8 + $0x4c] ss:$16 sps:$4 sm:$0xff]   ;;  %v4497_v58 = vld [vmem:[#allocation8 + $0x40] ss:$16 sps:$4 sm:$0xff]  }
 0x22e   :  { %2851 = vmatprep.subr.bf16.mxu0 %v4197_v59  ;;  %2974 = vmatprep.subr.bf16.mxu1 %v4199_v60  ;;  %v4500_v59 = vld [vmem:[#allocation8 + $0x48] ss:$16 sps:$4 sm:$0xff]   ;;  %v4505_v60 = vld [vmem:[#allocation8 + $0x64] ss:$16 sps:$4 sm:$0xff]  }
 0x231   :  { %2852 = vmatpush1.bf16.msra.mxu0 %v4196_v1  ;;  %2975 = vmatpush1.bf16.msra.mxu1 %v4198_v2  ;;  %v4509_v1 = vld [vmem:[#allocation8 + $0x80] ss:$16 sps:$4 sm:$0xff]   ;;  %v4512_v2 = vld [vmem:[#allocation8 + $0x88] ss:$16 sps:$4 sm:$0xff]  }
 0x232   :  { %2853 = vmatprep.subr.bf16.mxu0 %v4205_v12  ;;  %2976 = vmatprep.subr.bf16.mxu1 %v4207_v57  ;;  %v4517_v12 = vld [vmem:[#allocation8 + $0xa4] ss:$16 sps:$4 sm:$0xff]   ;;  %v4520_v57 = vld [vmem:[#allocation8 + $0xac] ss:$16 sps:$4 sm:$0xff]  }
 0x235   :  { %2854 = vmatpush1.bf16.msra.mxu0 %v4204_v22  ;;  %2977 = vmatpush1.bf16.msra.mxu1 %v4206_v7  ;;  %v4526_v22 = vld [vmem:[#allocation8 + $0xcc] ss:$16 sps:$4 sm:$0xff]  }
 0x236   :  { %2855 = vmatprep.subr.bf16.mxu0 %v4213_v8  ;;  %2978 = vmatprep.subr.bf16.mxu1 %v4215_v9 }
 0x239   :  { %2856 = vmatpush1.bf16.msra.mxu0 %v4212_v14  ;;  %2979 = vmatpush1.bf16.msra.mxu1 %v4214_v16 }
 0x23a   :  { %2857 = vmatprep.subr.bf16.mxu0 %v4221_v32  ;;  %2980 = vmatprep.subr.bf16.mxu1 %v4223_v17  ;;  %v4524_v32 = vld [vmem:[#allocation8 + $0xc8] ss:$16 sps:$4 sm:$0xff]   ;;  %v4529_v17 = vld [vmem:[#allocation8 + $0xe4] ss:$16 sps:$4 sm:$0xff]  }
 0x23d   :  { %2858 = vmatpush1.bf16.msra.mxu0 %v4220_v23  ;;  %2981 = vmatpush1.bf16.msra.mxu1 %v4222_v24  ;;  %v4535_v23 = vld [vmem:[#allocation8 + $0x104] ss:$16 sps:$4 sm:$0xff]   ;;  %v4538_v24 = vld [vmem:[#allocation8 + $0x10c] ss:$16 sps:$4 sm:$0xff]  }
 0x23e   :  { %2859 = vmatprep.subr.bf16.mxu0 %v4229_v26  ;;  %2982 = vmatprep.subr.bf16.mxu1 %v4231_v27  ;;  %v4533_v26 = vld [vmem:[#allocation8 + $0x100] ss:$16 sps:$4 sm:$0xff]   ;;  %v4536_v27 = vld [vmem:[#allocation8 + $0x108] ss:$16 sps:$4 sm:$0xff]  }
 0x241   :  { %2860 = vmatpush1.bf16.msra.mxu0 %v4228_v15  ;;  %2983 = vmatpush1.bf16.msra.mxu1 %v4230_v33  ;;  %v4547_v15 = vld [vmem:[#allocation8 + $0x144] ss:$16 sps:$4 sm:$0xff]   ;;  %v4550_v33 = vld [vmem:[#allocation8 + $0x14c] ss:$16 sps:$4 sm:$0xff]  }
 0x242   :  { %2861 = vmatprep.subr.bf16.mxu0 %v4237_v34  ;;  %2984 = vmatprep.subr.bf16.mxu1 %v4239_v35  ;;  %v4545_v34 = vld [vmem:[#allocation8 + $0x140] ss:$16 sps:$4 sm:$0xff]   ;;  %v4548_v35 = vld [vmem:[#allocation8 + $0x148] ss:$16 sps:$4 sm:$0xff]  }
 0x245   :  { %2862 = vmatpush1.bf16.msra.mxu0 %v4236_v41  ;;  %2985 = vmatpush1.bf16.msra.mxu1 %v4238_v42  ;;  %v4559_v41 = vld [vmem:[#allocation8 + $0x184] ss:$16 sps:$4 sm:$0xff]   ;;  %v4562_v42 = vld [vmem:[#allocation8 + $0x18c] ss:$16 sps:$4 sm:$0xff]  }
 0x246   :  { %2863 = vmatprep.subr.bf16.mxu0 %v4245_v43  ;;  %2986 = vmatprep.subr.bf16.mxu1 %v4247_v44  ;;  %v4557_v43 = vld [vmem:[#allocation8 + $0x180] ss:$16 sps:$4 sm:$0xff]   ;;  %v4560_v44 = vld [vmem:[#allocation8 + $0x188] ss:$16 sps:$4 sm:$0xff]  }
 0x249   :  { %2864 = vmatpush1.bf16.msra.mxu0 %v4244_v45  ;;  %2987 = vmatpush1.bf16.msra.mxu1 %v4246_v46  ;;  %v4565_v45 = vld [vmem:[#allocation8 + $0x1a4] ss:$16 sps:$4 sm:$0xff]   ;;  %v4568_v46 = vld [vmem:[#allocation8 + $0x1ac] ss:$16 sps:$4 sm:$0xff]  }
 0x24a   :  { %3405 = vmatprep.subr.bf16.mxu0 %v4487_v25  ;;  %3446 = vmatprep.subr.bf16.mxu1 %v4490_v47  ;;  %v4563_v25 = vld [vmem:[#allocation8 + $0x1a0] ss:$16 sps:$4 sm:$0xff]   ;;  %v4566_v47 = vld [vmem:[#allocation8 + $0x1a8] ss:$16 sps:$4 sm:$0xff]  }
 0x24c   :  { %2866 = vmatmul.mubr.bf16.vlgmr.msra.gmra.mrb[4].mxu0 %v5142_v36  ;;  %2989 = vmatmul.mubr.bf16.vlgmr.msra.gmra.mrb[4].mxu1 %v5142_v36  ;;  %v4506_v36 = vld [vmem:[#allocation8 + $0x68] ss:$16 sps:$4 sm:$0xff]  }
 0x24d   :  { %3406 = vmatpush1.bf16.msra.mxu0 %v4485_v48  ;;  %3447 = vmatpush1.bf16.msra.mxu1 %v4488_v49  ;;  %v4571_v48 = vld [vmem:[#allocation8 + $0x1c4] ss:$16 sps:$4 sm:$0xff]   ;;  %v4574_v49 = vld [vmem:[#allocation8 + $0x1cc] ss:$16 sps:$4 sm:$0xff]  }
 0x24e   :  { %3407 = vmatprep.subr.bf16.mxu0 %v4493_v50  ;;  %3448 = vmatprep.subr.bf16.mxu1 %v4496_v51  ;;  %v4569_v50 = vld [vmem:[#allocation8 + $0x1c0] ss:$16 sps:$4 sm:$0xff]   ;;  %v4572_v51 = vld [vmem:[#allocation8 + $0x1c8] ss:$16 sps:$4 sm:$0xff]  }
 0x251   :  { %3408 = vmatpush1.bf16.msra.mxu0 %v4491_v52  ;;  %3449 = vmatpush1.bf16.msra.mxu1 %v4494_v54  ;;  %v4577_v52 = vld [vmem:[#allocation8 + $0x1e4] ss:$16 sps:$4 sm:$0xff]   ;;  %v4580_v54 = vld [vmem:[#allocation8 + $0x1ec] ss:$16 sps:$4 sm:$0xff]  }
 0x252   :  { %3409 = vmatprep.subr.bf16.mxu0 %v4499_v55  ;;  %3450 = vmatprep.subr.bf16.mxu1 %v4502_v56  ;;  %v4575_v55 = vld [vmem:[#allocation8 + $0x1e0] ss:$16 sps:$4 sm:$0xff]   ;;  %v4578_v56 = vld [vmem:[#allocation8 + $0x1e8] ss:$16 sps:$4 sm:$0xff]  }
 0x255   :  { %3410 = vmatpush1.bf16.msra.mxu0 %v4497_v58  ;;  %3451 = vmatpush1.bf16.msra.mxu1 %v4500_v59  ;;  %v4900_v58 = vmov 0.0   ;;  %v3005_v59 = vlaneseq }
 0x256   :  { %3411 = vmatprep.subr.bf16.mxu0 %v4505_v60  ;;  %3452 = vmatprep.subr.bf16.mxu1 %v4508_v61 }
 0x257   :  { %v3006_v60 = vshrl.u32 %v3005_v59, 7 }
 0x259   :  { %3412 = vmatpush1.bf16.msra.mxu0 %v4503_v62  ;;  %3453 = vmatpush1.bf16.msra.mxu1 %v4506_v36  ;;  %v3007_v61 = vsub.s32 0, %v3006_v60  ;;  %v3003_v62 = vld [vmem:[#allocation7] sm:$0x3]  ;;  %v3011_v36 = vsub.s32 1, %v3006_v60 }
 0x25a   :  { %3413 = vmatprep.subr.bf16.mxu0 %v4511_v63  ;;  %3454 = vmatprep.subr.bf16.mxu1 %v4514_v0 }
 0x25d   :  { %3414 = vmatpush1.bf16.msra.mxu0 %v4509_v1  ;;  %3455 = vmatpush1.bf16.msra.mxu1 %v4512_v2 }
 0x25e   :  { %3415 = vmatprep.subr.bf16.mxu0 %v4517_v12  ;;  %3456 = vmatprep.subr.bf16.mxu1 %v4520_v57  ;;  %v3008_v12 = vrot.slane %v3003_v62, %v3007_v61 }
 0x25f   :  { %v5158_v6 = vpop.f32.mrb[0].mxu0  ;;  %v5160_v7 = vpop.f32.mrb[0].mxu1 }
 0x260   :  { %v5162_v8 = vpop.f32.mrb[1].mxu0  ;;  %v2997_v9 = vmax.f32 %v5158_v6, %v5160_v7  ;;  %v5166_v10 = vpop.f32.mrb[1].mxu1  ;;  %v4583_v6 = vld [vmem:[#allocation11 + $0x10] sm:$0xff]   ;;  %v4584_v7 = vld [vmem:[#allocation11 + $0x18] sm:$0xff]  }
 0x261   :  { %v2625_v53 = vpop.f32.mrb[2].mxu0  ;;  %3416 = vmatpush1.bf16.msra.mxu0 %v4515_v3  ;;  %v2998_v13 = vmax.f32 %v5162_v8, %v5166_v10  ;;  %v2748_v14 = vpop.f32.mrb[2].mxu1  ;;  %3457 = vmatpush1.bf16.msra.mxu1 %v4518_v4  ;;  %v4585_v8 = vld [vmem:[#allocation11 + $0x20] sm:$0xff]   ;;  %v4587_v10 = vld [vmem:[#allocation11 + $0x30] sm:$0xff]  }
 0x262   :  { %v2626_v16 = vpop.f32.mrb[3].mxu0  ;;  %3417 = vmatprep.subr.bf16.mxu0 %v4523_v5  ;;  %v2749_v18 = vpop.f32.mrb[3].mxu1  ;;  %3458 = vmatprep.subr.bf16.mxu1 %v4526_v22  ;;  %v3012_v5 = vrot.slane %v3003_v62, %v3011_v36 }
 0x265   :  { %3418 = vmatpush1.bf16.msra.mxu0 %v4521_v11  ;;  %3459 = vmatpush1.bf16.msra.mxu1 %v4524_v32 }
 0x266   :  { %3419 = vmatprep.subr.bf16.mxu0 %v4529_v17  ;;  %3460 = vmatprep.subr.bf16.mxu1 %v4532_v19 }
 0x269   :  { %3420 = vmatpush1.bf16.msra.mxu0 %v4527_v20  ;;  %3461 = vmatpush1.bf16.msra.mxu1 %v4530_v21  ;;  %v4581_v21 = vld [vmem:[#allocation11] sm:$0xff]  }
 0x26a   :  { %3421 = vmatprep.subr.bf16.mxu0 %v4535_v23  ;;  %3462 = vmatprep.subr.bf16.mxu1 %v4538_v24  ;;  %v4582_v24 = vld [vmem:[#allocation11 + $0x8] sm:$0xff]  }
 0x26d   :  { %3422 = vmatpush1.bf16.msra.mxu0 %v4533_v26  ;;  %3463 = vmatpush1.bf16.msra.mxu1 %v4536_v27  ;;  %v4589_v26 = vld [vmem:[#allocation14] sm:$0xff]   ;;  %v4590_v27 = vld [vmem:[#allocation14 + $0x8] sm:$0xff]  }
 0x26e   :  { %3423 = vmatprep.subr.bf16.mxu0 %v4541_v28  ;;  %3464 = vmatprep.subr.bf16.mxu1 %v4544_v29  ;;  %v4591_v28 = vld [vmem:[#allocation14 + $0x10] sm:$0xff]   ;;  %v4592_v29 = vld [vmem:[#allocation14 + $0x18] sm:$0xff]  }
 0x271   :  { %3424 = vmatpush1.bf16.msra.mxu0 %v4539_v30  ;;  %3465 = vmatpush1.bf16.msra.mxu1 %v4542_v31  ;;  %v4593_v30 = vld [vmem:[#allocation14 + $0x20] sm:$0xff]   ;;  %v4594_v31 = vld [vmem:[#allocation14 + $0x28] sm:$0xff]  }
 0x272   :  { %3425 = vmatprep.subr.bf16.mxu0 %v4547_v15  ;;  %3466 = vmatprep.subr.bf16.mxu1 %v4550_v33 }
 0x275   :  { %3426 = vmatpush1.bf16.msra.mxu0 %v4545_v34  ;;  %3467 = vmatpush1.bf16.msra.mxu1 %v4548_v35 }
 0x276   :  { %3427 = vmatprep.subr.bf16.mxu0 %v4553_v37  ;;  %3468 = vmatprep.subr.bf16.mxu1 %v4556_v38 }
 0x279   :  { %3428 = vmatpush1.bf16.msra.mxu0 %v4551_v39  ;;  %3469 = vmatpush1.bf16.msra.mxu1 %v4554_v40 }
 0x27a   :  { %3429 = vmatprep.subr.bf16.mxu0 %v4559_v41  ;;  %3470 = vmatprep.subr.bf16.mxu1 %v4562_v42  ;;  %v4312_v41 = vld [vmem:[#allocation10] ss:$0 sm:$0xff] }
 0x27d   :  { %3430 = vmatpush1.bf16.msra.mxu0 %v4557_v43  ;;  %3471 = vmatpush1.bf16.msra.mxu1 %v4560_v44 }
 0x27e   :  { %3431 = vmatprep.subr.bf16.mxu0 %v4565_v45  ;;  %3472 = vmatprep.subr.bf16.mxu1 %v4568_v46 }
 0x281   :  { %3432 = vmatpush1.bf16.msra.mxu0 %v4563_v25  ;;  %3473 = vmatpush1.bf16.msra.mxu1 %v4566_v47  ;;  %v4595_v47 = vld [vmem:[#allocation14 + $0x30] sm:$0xff]  }
 0x282   :  { %3433 = vmatprep.subr.bf16.mxu0 %v4571_v48  ;;  %3474 = vmatprep.subr.bf16.mxu1 %v4574_v49  ;;  %v4596_v48 = vld [vmem:[#allocation14 + $0x38] sm:$0xff]   ;;  %v4597_v49 = vld [vmem:[#allocation17] sm:$0xff]  }
 0x285   :  { %3434 = vmatpush1.bf16.msra.mxu0 %v4569_v50  ;;  %3475 = vmatpush1.bf16.msra.mxu1 %v4572_v51  ;;  %v4598_v50 = vld [vmem:[#allocation17 + $0x8] sm:$0xff]   ;;  %v4599_v51 = vld [vmem:[#allocation17 + $0x10] sm:$0xff]  }
 0x286   :  { %3435 = vmatprep.subr.bf16.mxu0 %v4577_v52  ;;  %3476 = vmatprep.subr.bf16.mxu1 %v4580_v54  ;;  %v4600_v52 = vld [vmem:[#allocation17 + $0x18] sm:$0xff]   ;;  %v4601_v54 = vld [vmem:[#allocation17 + $0x20] sm:$0xff]  }
 0x289   :  { %3436 = vmatpush1.bf16.msra.mxu0 %v4575_v55  ;;  %3477 = vmatpush1.bf16.msra.mxu1 %v4578_v56  ;;  %v4602_v55 = vld [vmem:[#allocation17 + $0x28] sm:$0xff]   ;;  %v4313_v56 = vld [vmem:[#allocation13] ss:$0 sm:$0xff] }
 0x28a   :  { %4367 = vmatprep.subr.bf16.mxu0 %v4900_v58  ;;  %4387 = vmatprep.subr.bf16.mxu1 %v4900_v58 }
 0x31f   :  { %v2867_v63 = vpop.f32.mrb[4].mxu0  ;;  %v2990_v0 = vpop.f32.mrb[4].mxu1 }
 0x320   :  { %v2869_v1 = vpop.f32.mrb[5].mxu0  ;;  %v2999_v2 = vmax.f32 %v2867_v63, %v2990_v0  ;;  %v2992_v57 = vpop.f32.mrb[5].mxu1 }
 0x321   :  { %v2871_v3 = vpop.f32.mrb[6].mxu0  ;;  %v3000_v4 = vmax.f32 %v2869_v1, %v2992_v57  ;;  %v2994_v22 = vpop.f32.mrb[6].mxu1  ;;  %v4603_v1 = vld [vmem:[#allocation17 + $0x30] sm:$0xff]  }
 0x322   :  { %v2872_v53 = vpop.f32.mrb[7].mxu0  ;;  %v3001_v11 = vmax.f32 %v2997_v9, %v2999_v2  ;;  %v2995_v14 = vpop.f32.mrb[7].mxu1  ;;  %v4586_v9 = vld [vmem:[#allocation11 + $0x28] sm:$0xff]   ;;  %v4604_v2 = vld [vmem:[#allocation17 + $0x38] sm:$0xff]  }
 0x323   :  { %v3002_v16 = vmax.f32 %v2998_v13, %v3000_v4  ;;  %v4588_v13 = vld [vmem:[#allocation11 + $0x38] sm:$0xff]   ;;  %v4331_v14 = vld [vmem:[#allocation19] ss:$0 sm:$0xff] }
 0x324   :  { %v3015_v32 = vadd.f32 %v3008_v12, %v3001_v11  ;;  %v4322_v12 = vld [vmem:[#allocation16] ss:$0 sm:$0xff] }
 0x325   :  { %v3016_v17 = vadd.f32 %v3012_v5, %v3002_v16 }
 0x326   :  { %v3017_v18 = vmax.f32 %v3015_v32, 0.0 }
 0x327   :  { %v3018_v19 = vmax.f32 %v3016_v17, 0.0 }
 0x328   :  { %v3019_v23 = vpack.c.bf16 %v3017_v18, %v3017_v18 }
 0x329   :  { %v3020_v20 = vpack.c.bf16 %v3018_v19, %v3018_v19 }
 0x32b   :  { %3437 = vmatprep.mubr.bf16.mxu0 %v3020_v20  ;;  %3478 = vmatprep.mubr.bf16.mxu1 %v3020_v20 }
 0x32c   :  { %3438 = vmatmul.mubr.bf16.vlgmr.msra.gmra.mrb[8].mxu0 %v3019_v23  ;;  %3479 = vmatmul.mubr.bf16.vlgmr.msra.gmra.mrb[8].mxu1 %v3019_v23 }
 0x32d   :  { %4368 = vmatpush3.bf16.msra.mxu0 %v4581_v21  ;;  %4383 = vmatprep.mubr.msk.bf16.mxu0 %vm4901_vm0, %v4900_v58 }
 0x32e   :  { %4369 = vmatprep.subr.bf16.mxu0 %v4900_v58  ;;  %4403 = vmatprep.mubr.msk.bf16.mxu1 %vm4901_vm0, %v4900_v58 }
 0x32f   :  { %4388 = vmatpush3.bf16.msra.mxu1 %v4589_v26 }
 0x330   :  { %4389 = vmatprep.subr.bf16.mxu1 %v4900_v58 }
 0x331   :  { %4370 = vmatpush3.bf16.msra.mxu0 %v4582_v24 }
 0x332   :  { %4371 = vmatprep.subr.bf16.mxu0 %v4900_v58 }
 0x333   :  { %4390 = vmatpush3.bf16.msra.mxu1 %v4590_v27 }
 0x334   :  { %4391 = vmatprep.subr.bf16.mxu1 %v4900_v58 }
 0x335   :  { %4372 = vmatpush3.bf16.msra.mxu0 %v4583_v6 }
 0x336   :  { %4373 = vmatprep.subr.bf16.mxu0 %v4900_v58 }
 0x337   :  { %4392 = vmatpush3.bf16.msra.mxu1 %v4591_v28 }
 0x338   :  { %4393 = vmatprep.subr.bf16.mxu1 %v4900_v58 }
 0x339   :  { %4374 = vmatpush3.bf16.msra.mxu0 %v4584_v7 }
 0x33a   :  { %4375 = vmatprep.subr.bf16.mxu0 %v4900_v58 }
 0x33b   :  { %4394 = vmatpush3.bf16.msra.mxu1 %v4592_v29 }
 0x33c   :  { %4395 = vmatprep.subr.bf16.mxu1 %v4900_v58 }
 0x33d   :  { %4376 = vmatpush3.bf16.msra.mxu0 %v4585_v8 }
 0x33e   :  { %4377 = vmatprep.subr.bf16.mxu0 %v4900_v58 }
 0x33f   :  { %4396 = vmatpush3.bf16.msra.mxu1 %v4593_v30 }
 0x340   :  { %4397 = vmatprep.subr.bf16.mxu1 %v4900_v58 }
 0x341   :  { %4378 = vmatpush3.bf16.msra.mxu0 %v4586_v9 }
 0x342   :  { %4379 = vmatprep.subr.bf16.mxu0 %v4900_v58 }
 0x343   :  { %4398 = vmatpush3.bf16.msra.mxu1 %v4594_v31 }
 0x344   :  { %4399 = vmatprep.subr.bf16.mxu1 %v4900_v58 }
 0x345   :  { %4380 = vmatpush3.bf16.msra.mxu0 %v4587_v10 }
 0x346   :  { %4381 = vmatprep.subr.bf16.mxu0 %v4900_v58 }
 0x347   :  { %4400 = vmatpush3.bf16.msra.mxu1 %v4595_v47 }
 0x348   :  { %4401 = vmatprep.subr.bf16.mxu1 %v4900_v58 }
 0x349   :  { %4382 = vmatpush3.bf16.msra.mxu0 %v4588_v13 }
 0x34a   :  { %4407 = vmatprep.subr.bf16.mxu0 %v4900_v58 }
 0x34b   :  { %4402 = vmatpush3.bf16.msra.mxu1 %v4596_v48 }
 0x3ff   :  { %v3439_v15 = vpop.f32.mrb[8].mxu0  ;;  %v3480_v33 = vpop.f32.mrb[8].mxu1 }
 0x400   :  { %v3441_v34 = vpop.f32.mrb[9].mxu0  ;;  %v3482_v35 = vpop.f32.mrb[9].mxu1 }
 0x401   :  { %v3487_v37 = vmax.f32 %v3439_v15, %v3441_v34  ;;  %v3488_v38 = vmax.f32 %v3480_v33, %v3482_v35  ;;  %v3443_v39 = vpop.f32.mrb[10].mxu0  ;;  %v3484_v40 = vpop.f32.mrb[10].mxu1 }
 0x402   :  { %v3444_v42 = vpop.f32.mrb[11].mxu0  ;;  %v3485_v43 = vpop.f32.mrb[11].mxu1 }
 0x403   :  { %v3489_v44 = vmax.f32 %v3487_v37, %v3488_v38 }
 0x405   :  { %v3497_v45 = vadd.f32 %v4312_v41, %v3489_v44 }
 0x407   :  { %v3498_v46 = vmax.f32 %v3497_v45, 0.0 }
 0x409   :  { %v3499_v25 = vpack.c.bf16 %v3498_v46, %v3498_v46 }
 0x40b   :  { %4384 = vmatmul.mubr.bf16.vlgmr.msra.gmra.mrb[12].mxu0 %v3499_v25 }
 0x40c   :  { %4423 = vmatprep.mubr.msk.bf16.mxu0 %vm4901_vm0, %v4900_v58  ;;  %4408 = vmatpush3.bf16.msra.mxu0 %v4597_v49 }
 0x40d   :  { %4409 = vmatprep.subr.bf16.mxu0 %v4900_v58 }
 0x410   :  { %4410 = vmatpush3.bf16.msra.mxu0 %v4598_v50 }
 0x411   :  { %4411 = vmatprep.subr.bf16.mxu0 %v4900_v58 }
 0x414   :  { %4412 = vmatpush3.bf16.msra.mxu0 %v4599_v51 }
 0x415   :  { %4413 = vmatprep.subr.bf16.mxu0 %v4900_v58 }
 0x418   :  { %4414 = vmatpush3.bf16.msra.mxu0 %v4600_v52 }
 0x419   :  { %4415 = vmatprep.subr.bf16.mxu0 %v4900_v58 }
 0x41c   :  { %4416 = vmatpush3.bf16.msra.mxu0 %v4601_v54 }
 0x41d   :  { %4417 = vmatprep.subr.bf16.mxu0 %v4900_v58 }
 0x420   :  { %4418 = vmatpush3.bf16.msra.mxu0 %v4602_v55 }
 0x421   :  { %4419 = vmatprep.subr.bf16.mxu0 %v4900_v58 }
 0x424   :  { %4420 = vmatpush3.bf16.msra.mxu0 %v4603_v1 }
 0x425   :  { %4421 = vmatprep.subr.bf16.mxu0 %v4900_v58 }
 0x428   :  { %4422 = vmatpush3.bf16.msra.mxu0 %v4604_v2 }
 0x4de   :  { %v3605_v59 = vpop.f32.mrb[12].mxu0 }
 0x4df   :  { %v3606_v60 = vadd.f32 %v4313_v56, %v3605_v59  ;;  %v4385_v61 = vpop.f32.mrb[13].mxu0 }
 0x4e0   :  { %v3608_v62 = vpop.f32.mrb[14].mxu0 }
 0x4e1   :  { %v3611_v36 = vmax.f32 %v3606_v60, 0.0  ;;  %v4386_v63 = vpop.f32.mrb[15].mxu0 }
 0x4e3   :  { %v3612_v0 = vpack.c.bf16 %v3611_v36, %v3611_v36 }
 0x4e5   :  { %4404 = vmatmul.mubr.bf16.vlgmr.msra.gmra.mrb[12].mxu1 %v3612_v0 }
 0x5b8   :  { %v3718_v57 = vpop.f32.mrb[12].mxu1 }
 0x5b9   :  { %v3719_v3 = vadd.f32 %v4322_v12, %v3718_v57  ;;  %v4405_v4 = vpop.f32.mrb[13].mxu1 }
 0x5ba   :  { %v3721_v5 = vpop.f32.mrb[14].mxu1 }
 0x5bb   :  { %v3724_v22 = vmax.f32 %v3719_v3, 0.0  ;;  %v4406_v53 = vpop.f32.mrb[15].mxu1 }
 0x5bd   :  { %v3725_v11 = vpack.c.bf16 %v3724_v22, %v3724_v22 }
 0x5bf   :  { %4424 = vmatmul.mubr.bf16.vlgmr.msra.gmra.mrb[16].mxu0 %v3725_v11 }
 0x692   :  { %v3831_v16 = vpop.f32.mrb[16].mxu0 }
 0x693   :  { %v3832_v32 = vadd.f32 %v4331_v14, %v3831_v16  ;;  %v4425_v17 = vpop.f32.mrb[17].mxu0 }
 0x694   :  { %v3834_v18 = vpop.f32.mrb[18].mxu0 }
 0x695   :  { %3837 = vst [vmem:[#allocation20] sm:$0xff] %v3832_v32  ;;  %v4426_v58 = vpop.f32.mrb[19].mxu0 }
 0x696   :  { %4858 = shalt.err (!%p4855_p8)
}
 0x697   :  { %s4859_s21 = scalar_lea.hbm %s5229_s11, 128 }
 0x698   :  { %p4860_p9 = scmp.ne.s32.totalorder %s5229_s11, %s4859_s21  ;;  %p4863_p10 = scmp.lt.u32.totalorder %s4859_s21, %s5229_s11 }
 0x69a   :  { %p4865_p11 = pnand %p4863_p10, %p4860_p9 }
 0x69c   :  { %4868 = shalt.err (!%p4865_p11)
}
 0x69d   :  { %3847 = dma.vmem_to_hbm [thread:$0]  %s3845_s22, 128, %s5229_s11, [#allocation4]  }
 0x69e   :  { %4881 = dma.done.wait [#allocation4], 128  }
 0x69f   :  { %4882 = vsyncadd [#allocation4], 4294967168 }
 0x6a0   :  { %3851 = vsyncpa [#allocation3], 1 }
 0x6a1   :  { %3852 = vsyncpa [#allocation6], 1 }
 0x6a2   :  { %3853 = vsyncpa [#allocation9], 1 }
 0x6a3   :  { %3854 = vsyncpa [#allocation12], 1 }
 0x6a4   :  { %3855 = vsyncpa [#allocation15], 1 }
 0x6a5   :  { %3856 = vsyncpa [#allocation18], 1 }
 0x6a6   :  { %3857 = vsyncpa [#allocation4], 1 }

</bundles_post_ra>
